<compile_context>
chip_gen: v7x
topology: tpu7x:2x2x1
jax: 0.10.0
libtpu: 0.0.40
codegen_flags: <defaults>
</compile_context>

<pallas_src>
import functools

import jax
import jax.numpy as jnp
from jax import lax
from jax.experimental import pallas as pl
from jax.experimental.pallas import tpu as pltpu

EPS = 1e-5
LANES = 128


def _round_up(x, m):
    return (x + m - 1) // m * m


def _largest_divisor_leq(n, cap):
    cap = max(1, min(n, cap))
    for d in range(cap, 0, -1):
        if n % d == 0:
            return d
    return 1


def _vmem_capacity_bytes():
    """Generation-aware VMEM capacity; conservative fallback = v7x (64 MiB)."""
    try:
        info = pltpu.get_tpu_info()
        cap = int(getattr(info, "vmem_capacity_bytes", 0) or 0)
        if cap > 0:
            return cap
    except Exception:
        pass
    return 64 * 1024 * 1024


def conv_stats_kernel(x_ref, w_ref, conv_ref, sum_ref, sq_ref, col_ref, acc_ref):
    """One grid step = one (image, output-row-tile).

    x_ref:    (1, TH1+KH-1, Wp, Cin_p)  zero-padded bf16 input row-slab (with halo rows)
    w_ref:    (KH, KW*Cin_p, Cout_p)    bf16 weights, constant block index (grid-resident)
    conv_ref: (1, TH1, W_out, Cout_p)   conv output tile, bf16
    sum_ref:  (1, 1, Cout_p)            per-tile per-channel sum (from the f32 acc)
    sq_ref:   (1, 1, Cout_p)            per-tile per-channel sum of squares
    col_ref:  (TH1*W_out, KW*Cin_p)     kw-grouped operand scratch for ONE kh tap, bf16
    acc_ref:  (TH1*W_out, Cout_p)       f32 accumulator scratch
    """
    _, TH1, W_out, Cout_p = conv_ref.shape
    slab_rows, Wp, Cin_p = x_ref.shape[1], x_ref.shape[2], x_ref.shape[3]
    KH = slab_rows - TH1 + 1
    KW = Wp - W_out + 1

    for kh in range(KH):
        # Gather the KW taps of this kh row-slab (K = KW*Cin_p keeps the MXU full
        # even when Cin_p == 128); the gather of step kh+1 overlaps the matmul of kh.
        # TODO(synk): on v5e, build the kw shifts with pltpu.roll on the contiguous
        # kh row-slab to take the copies off the single vector-store slot.
        for kw in range(KW):
            win = x_ref[0, kh:kh + TH1, kw:kw + W_out, :]          # (TH1, W_out, Cin_p)
            col_ref[:, kw * Cin_p:(kw + 1) * Cin_p] = win.reshape(TH1 * W_out, Cin_p)
        contrib = jnp.dot(col_ref[...], w_ref[kh],
                          preferred_element_type=jnp.float32)
        if kh == 0:
            acc_ref[...] = contrib
        else:
            acc_ref[...] += contrib

    acc = acc_ref[...]                                              # f32 (TH1*W_out, Cout_p)
    # bf16 intermediate to HBM; BN partial stats taken from the f32 accumulator.
    conv_ref[...] = acc.reshape(1, TH1, W_out, Cout_p).astype(conv_ref.dtype)
    sum_ref[...] = jnp.sum(acc, axis=0).reshape(1, 1, Cout_p)
    sq_ref[...] = jnp.sum(acc * acc, axis=0).reshape(1, 1, Cout_p)


def bn_relu_kernel(conv_ref, scale_ref, shift_ref, o_ref):
    """Folded BN affine + ReLU on one (image, row-tile)."""
    y = conv_ref[...].astype(jnp.float32) * scale_ref[...] + shift_ref[...]
    o_ref[...] = jnp.maximum(y, 0.0)


def _forward_nhwc(x_nhwc, weight_oihw, gamma, beta, padding):
    """Conv(bias=False) -> BN(training batch stats, eps=1e-5) -> ReLU.  NHWC in/out."""
    # TODO(synk): dilation != 1 / stride != 1 are not implemented (module defaults).
    N, H, W, Cin = x_nhwc.shape
    Cout, _, KH, KW = weight_oihw.shape
    H_out = H + 2 * padding - KH + 1
    W_out = W + 2 * padding - KW + 1
    Wp = W_out + KW - 1
    Cin_p = _round_up(Cin, LANES)
    Cout_p = _round_up(Cout, LANES)

    vmem_cap = _vmem_capacity_bytes()
    vmem_limit = int(vmem_cap * 0.8)       # ~51 MiB on v7x, ~102 MiB on v5e/v6e

    # Pass-1 row tile: plenty of MXU work per step (M = TH1*W_out) while keeping the
    # per-step working set small and giving the pipeline several grid steps.
    TH1 = _largest_divisor_leq(H_out, 8)
    n_tiles1 = H_out // TH1
    slab_rows = TH1 + KH - 1

    # ---- XLA glue: zero/channel pad (bf16) + halo'd row slabs so pass 1 is a plain
    #      BlockSpec-pipelined kernel even though consecutive tiles overlap by KH-1.
    x_pad = jnp.pad(
        x_nhwc.astype(jnp.bfloat16),
        ((0, 0), (padding, padding), (padding, padding), (0, Cin_p - Cin)),
    )
    x_slabs = jnp.stack(
        [lax.slice_in_dim(x_pad, t * TH1, t * TH1 + slab_rows, axis=1)
         for t in range(n_tiles1)],
        axis=1,
    ).reshape(N * n_tiles1, slab_rows, Wp, Cin_p)

    w = jnp.transpose(weight_oihw, (2, 3, 1, 0))                    # (KH, KW, Cin, Cout)
    w = jnp.pad(w, ((0, 0), (0, 0), (0, Cin_p - Cin), (0, Cout_p - Cout)))
    w_col = w.reshape(KH, KW * Cin_p, Cout_p).astype(jnp.bfloat16)

    # ---- Pass 1: conv (kh-grouped accumulating MXU matmuls) + partial BN stats ------
    conv_out, part_sum, part_sq = pl.pallas_call(
        conv_stats_kernel,
        grid_spec=pltpu.PrefetchScalarGridSpec(
            num_scalar_prefetch=0,
            grid=(N, n_tiles1),
            in_specs=[
                pl.BlockSpec((1, slab_rows, Wp, Cin_p),
                             lambda n, h: (n * n_tiles1 + h, 0, 0, 0)),
                # Constant block index -> fetched once, grid-resident.
                # TODO(synk): on v7x with huge weights (e.g. 3x3x2048x512) force
                # single-buffering of this block or split K over an "arbitrary" axis.
                pl.BlockSpec((KH, KW * Cin_p, Cout_p), lambda n, h: (0, 0, 0)),
            ],
            out_specs=[
                pl.BlockSpec((1, TH1, W_out, Cout_p), lambda n, h: (n, h, 0, 0)),
                pl.BlockSpec((1, 1, Cout_p), lambda n, h: (n * n_tiles1 + h, 0, 0)),
                pl.BlockSpec((1, 1, Cout_p), lambda n, h: (n * n_tiles1 + h, 0, 0)),
            ],
            scratch_shapes=[
                pltpu.VMEM((TH1 * W_out, KW * Cin_p), jnp.bfloat16),
                pltpu.VMEM((TH1 * W_out, Cout_p), jnp.float32),
            ],
        ),
        out_shape=[
            jax.ShapeDtypeStruct((N, H_out, W_out, Cout_p), jnp.bfloat16),
            jax.ShapeDtypeStruct((N * n_tiles1, 1, Cout_p), jnp.float32),
            jax.ShapeDtypeStruct((N * n_tiles1, 1, Cout_p), jnp.float32),
        ],
        compiler_params=pltpu.CompilerParams(
            dimension_semantics=("parallel", "parallel"),
            vmem_limit_bytes=vmem_limit,
        ),
    )(x_slabs, w_col)

    # ---- Tiny XLA glue: global batch stats + folded BN affine (per-channel) ---------
    count = N * H_out * W_out
    s = jnp.sum(part_sum, axis=(0, 1))
    sq = jnp.sum(part_sq, axis=(0, 1))
    mean = s / count
    var = jnp.maximum(sq / count - mean * mean, 0.0)                 # biased var, clamped
    gamma_p = jnp.pad(gamma.astype(jnp.float32), (0, Cout_p - Cout), constant_values=1.0)
    beta_p = jnp.pad(beta.astype(jnp.float32), (0, Cout_p - Cout))
    scale = gamma_p * lax.rsqrt(var + EPS)
    shift = beta_p - mean * scale
    scale3 = scale.reshape(1, 1, Cout_p)
    shift3 = shift.reshape(1, 1, Cout_p)

    # ---- Pass 2: normalize + ReLU.  Mem-bound -> biggest row tile that fits VMEM ----
    row_bytes = W_out * Cout_p * (2 + 4) * 2      # bf16 in + f32 out, double-buffered
    cap_rows = max(1, (vmem_limit // 2) // row_bytes)
    TH2 = _largest_divisor_leq(H_out, cap_rows)
    out_nhwc_p = pl.pallas_call(
        bn_relu_kernel,
        grid_spec=pltpu.PrefetchScalarGridSpec(
            num_scalar_prefetch=0,
            grid=(N, H_out // TH2),
            in_specs=[
                pl.BlockSpec((1, TH2, W_out, Cout_p), lambda n, h: (n, h, 0, 0)),
                # Constant index -> scale/shift stay VMEM-resident across the grid.
                pl.BlockSpec((1, 1, Cout_p), lambda n, h: (0, 0, 0)),
                pl.BlockSpec((1, 1, Cout_p), lambda n, h: (0, 0, 0)),
            ],
            out_specs=pl.BlockSpec((1, TH2, W_out, Cout_p), lambda n, h: (n, h, 0, 0)),
        ),
        out_shape=jax.ShapeDtypeStruct((N, H_out, W_out, Cout_p), jnp.float32),
        compiler_params=pltpu.CompilerParams(
            dimension_semantics=("parallel", "parallel"),
            vmem_limit_bytes=vmem_limit,
        ),
    )(conv_out, scale3, shift3)

    return out_nhwc_p[..., :Cout]


@functools.partial(jax.jit, static_argnames=("padding",))
def upernet_conv_module_nhwc(x_nhwc, weight_oihw, gamma, beta, *, padding=1):
    """NHWC in / NHWC out entry point (use when chaining ConvModules to avoid
    per-call NCHW<->NHWC transposes)."""
    return _forward_nhwc(x_nhwc, weight_oihw, gamma, beta, padding)


@functools.partial(jax.jit, static_argnames=("padding",))
def upernet_conv_module(x_nchw, weight_oihw, gamma, beta, *, padding=1):
    """NCHW in / NCHW out, matching the PyTorch module contract."""
    x_nhwc = jnp.transpose(x_nchw, (0, 2, 3, 1))
    out = _forward_nhwc(x_nhwc, weight_oihw, gamma, beta, padding)
    return jnp.transpose(out, (0, 3, 1, 2))


if __name__ == "__main__":
    # Module config: in_channels=4, out_channels=8, kernel_size=3, padding=1, bias=False
    N, Cin, H, W = 2, 4, 16, 16
    Cout, KH, KW = 8, 3, 3

    key = jax.random.PRNGKey(0)
    kx, kw = jax.random.split(key)
    x = jax.random.normal(kx, (N, Cin, H, W), dtype=jnp.float32)
    weight = jax.random.normal(kw, (Cout, Cin, KH, KW), dtype=jnp.float32) * 0.1
    gamma = jnp.ones((Cout,), dtype=jnp.float32)    # PyTorch BN default init
    beta = jnp.zeros((Cout,), dtype=jnp.float32)

    out = upernet_conv_module(x, weight, gamma, beta, padding=1)
    out = jax.block_until_ready(out)
    assert out.shape == (N, Cout, H, W)

    # Reference: f32 conv of bf16-rounded operands + f32 training-mode BN + ReLU.
    x_bf = x.astype(jnp.bfloat16).astype(jnp.float32)
    w_bf = weight.astype(jnp.bfloat16).astype(jnp.float32)
    ref_conv = lax.conv_general_dilated(
        x_bf, w_bf, window_strides=(1, 1), padding=((1, 1), (1, 1)),
        dimension_numbers=("NCHW", "OIHW", "NCHW"),
    )
    mean = jnp.mean(ref_conv, axis=(0, 2, 3), keepdims=True)
    var = jnp.mean((ref_conv - mean) ** 2, axis=(0, 2, 3), keepdims=True)
    ref = jnp.maximum(
        (ref_conv - mean) * lax.rsqrt(var + EPS) * gamma.reshape(1, -1, 1, 1)
        + beta.reshape(1, -1, 1, 1),
        0.0,
    )
    err = float(jnp.max(jnp.abs(out - ref)))
    # bf16 conv intermediate between the two passes -> slightly looser tolerance.
    assert err < 3e-2, err

    print("KERNEL_OK")
</pallas_src>

<mosaic_0001>
module attributes {stable_mosaic.version = 11 : i64} {
  func.func @conv_stats_kernel(%arg0: i32, %arg1: i32, %arg2: memref<1x10x18x128xbf16, #tpu.memory_space<vmem>>, %arg3: memref<3x384x128xbf16, #tpu.memory_space<vmem>>, %arg4: memref<1x8x16x128xbf16, #tpu.memory_space<vmem>>, %arg5: memref<1x1x128xf32, #tpu.memory_space<vmem>>, %arg6: memref<1x1x128xf32, #tpu.memory_space<vmem>>, %arg7: memref<128x384xbf16, #tpu.memory_space<vmem>>, %arg8: memref<128x128xf32, #tpu.memory_space<vmem>>) attributes {dimension_semantics = [#tpu.dimension_semantics<parallel>, #tpu.dimension_semantics<parallel>], iteration_bounds = array<i64: 2, 2>, scalar_prefetch = 0 : i64, scratch_operands = 2 : i64, tpu.core_type = #tpu.core_type<tc>, window_params = [{transform_indices = @transform_0, window_bounds = array<i64: 1, 10, 18, 128>}, {pipeline_mode = #tpu.pipeline_mode<synchronous>, transform_indices = @transform_1, window_bounds = array<i64: 3, 384, 128>}, {transform_indices = @transform_2, window_bounds = array<i64: 1, 8, 16, 128>}, {transform_indices = @transform_3, window_bounds = array<i64: 1, 1, 128>}, {transform_indices = @transform_4, window_bounds = array<i64: 1, 1, 128>}]} {
    %c0 = arith.constant 0 : index
    %c0_0 = arith.constant 0 : index
    %c0_1 = arith.constant 0 : index
    %c0_2 = arith.constant 0 : index
    %0 = vector.load %arg2[%c0, %c0_0, %c0_1, %c0_2] : memref<1x10x18x128xbf16, #tpu.memory_space<vmem>>, vector<1x8x16x128xbf16>
    %1 = vector.shape_cast %0 : vector<1x8x16x128xbf16> to vector<8x16x128xbf16>
    %2 = vector.shape_cast %1 : vector<8x16x128xbf16> to vector<128x128xbf16>
    %c0_3 = arith.constant 0 : index
    %c0_4 = arith.constant 0 : index
    %3 = vector.load %arg7[%c0_3, %c0_4] : memref<128x384xbf16, #tpu.memory_space<vmem>>, vector<128x128xbf16>
    tpu.vector_store %arg7[%c0_3, %c0_4], %2 {strides = array<i32>} : memref<128x384xbf16, #tpu.memory_space<vmem>>, vector<128x128xbf16>,
    %c0_5 = arith.constant 0 : index
    %c0_6 = arith.constant 0 : index
    %c1 = arith.constant 1 : index
    %c0_7 = arith.constant 0 : index
    %4 = vector.load %arg2[%c0_5, %c0_6, %c1, %c0_7] : memref<1x10x18x128xbf16, #tpu.memory_space<vmem>>, vector<1x8x16x128xbf16>
    %5 = vector.shape_cast %4 : vector<1x8x16x128xbf16> to vector<8x16x128xbf16>
    %6 = vector.shape_cast %5 : vector<8x16x128xbf16> to vector<128x128xbf16>
    %c0_8 = arith.constant 0 : index
    %c128 = arith.constant 128 : index
    %7 = vector.load %arg7[%c0_8, %c128] : memref<128x384xbf16, #tpu.memory_space<vmem>>, vector<128x128xbf16>
    tpu.vector_store %arg7[%c0_8, %c128], %6 {strides = array<i32>} : memref<128x384xbf16, #tpu.memory_space<vmem>>, vector<128x128xbf16>,
    %c0_9 = arith.constant 0 : index
    %c0_10 = arith.constant 0 : index
    %c2 = arith.constant 2 : index
    %c0_11 = arith.constant 0 : index
    %8 = vector.load %arg2[%c0_9, %c0_10, %c2, %c0_11] : memref<1x10x18x128xbf16, #tpu.memory_space<vmem>>, vector<1x8x16x128xbf16>
    %9 = vector.shape_cast %8 : vector<1x8x16x128xbf16> to vector<8x16x128xbf16>
    %10 = vector.shape_cast %9 : vector<8x16x128xbf16> to vector<128x128xbf16>
    %c0_12 = arith.constant 0 : index
    %c256 = arith.constant 256 : index
    %11 = vector.load %arg7[%c0_12, %c256] : memref<128x384xbf16, #tpu.memory_space<vmem>>, vector<128x128xbf16>
    tpu.vector_store %arg7[%c0_12, %c256], %10 {strides = array<i32>} : memref<128x384xbf16, #tpu.memory_space<vmem>>, vector<128x128xbf16>,
    %c0_13 = arith.constant 0 : index
    %c0_14 = arith.constant 0 : index
    %12 = vector.load %arg7[%c0_13, %c0_14] : memref<128x384xbf16, #tpu.memory_space<vmem>>, vector<128x384xbf16>
    %c0_15 = arith.constant 0 : index
    %c0_16 = arith.constant 0 : index
    %c0_17 = arith.constant 0 : index
    %13 = vector.load %arg3[%c0_15, %c0_16, %c0_17] : memref<3x384x128xbf16, #tpu.memory_space<vmem>>, vector<1x384x128xbf16>
    %14 = vector.shape_cast %13 : vector<1x384x128xbf16> to vector<384x128xbf16>
    %cst = arith.constant dense<0.000000e+00> : vector<128x128xf32>
    %15 = tpu.matmul %12, %14, %cst {dimension_numbers = #tpu.dot_dimension_numbers<[1], [0], [0], [1], [0, 0, 1, 1], [], []>} : vector<128x384xbf16>, vector<384x128xbf16>, vector<128x128xf32> -> vector<128x128xf32>
    %c0_18 = arith.constant 0 : index
    %c0_19 = arith.constant 0 : index
    %16 = vector.load %arg8[%c0_18, %c0_19] : memref<128x128xf32, #tpu.memory_space<vmem>>, vector<128x128xf32>
    tpu.vector_store %arg8[%c0_18, %c0_19], %15 {strides = array<i32>} : memref<128x128xf32, #tpu.memory_space<vmem>>, vector<128x128xf32>,
    %c0_20 = arith.constant 0 : index
    %c1_21 = arith.constant 1 : index
    %c0_22 = arith.constant 0 : index
    %c0_23 = arith.constant 0 : index
    %17 = vector.load %arg2[%c0_20, %c1_21, %c0_22, %c0_23] : memref<1x10x18x128xbf16, #tpu.memory_space<vmem>>, vector<1x8x16x128xbf16>
    %18 = vector.shape_cast %17 : vector<1x8x16x128xbf16> to vector<8x16x128xbf16>
    %19 = vector.shape_cast %18 : vector<8x16x128xbf16> to vector<128x128xbf16>
    %c0_24 = arith.constant 0 : index
    %c0_25 = arith.constant 0 : index
    %20 = vector.load %arg7[%c0_24, %c0_25] : memref<128x384xbf16, #tpu.memory_space<vmem>>, vector<128x128xbf16>
    tpu.vector_store %arg7[%c0_24, %c0_25], %19 {strides = array<i32>} : memref<128x384xbf16, #tpu.memory_space<vmem>>, vector<128x128xbf16>,
    %c0_26 = arith.constant 0 : index
    %c1_27 = arith.constant 1 : index
    %c1_28 = arith.constant 1 : index
    %c0_29 = arith.constant 0 : index
    %21 = vector.load %arg2[%c0_26, %c1_27, %c1_28, %c0_29] : memref<1x10x18x128xbf16, #tpu.memory_space<vmem>>, vector<1x8x16x128xbf16>
    %22 = vector.shape_cast %21 : vector<1x8x16x128xbf16> to vector<8x16x128xbf16>
    %23 = vector.shape_cast %22 : vector<8x16x128xbf16> to vector<128x128xbf16>
    %c0_30 = arith.constant 0 : index
    %c128_31 = arith.constant 128 : index
    %24 = vector.load %arg7[%c0_30, %c128_31] : memref<128x384xbf16, #tpu.memory_space<vmem>>, vector<128x128xbf16>
    tpu.vector_store %arg7[%c0_30, %c128_31], %23 {strides = array<i32>} : memref<128x384xbf16, #tpu.memory_space<vmem>>, vector<128x128xbf16>,
    %c0_32 = arith.constant 0 : index
    %c1_33 = arith.constant 1 : index
    %c2_34 = arith.constant 2 : index
    %c0_35 = arith.constant 0 : index
    %25 = vector.load %arg2[%c0_32, %c1_33, %c2_34, %c0_35] : memref<1x10x18x128xbf16, #tpu.memory_space<vmem>>, vector<1x8x16x128xbf16>
    %26 = vector.shape_cast %25 : vector<1x8x16x128xbf16> to vector<8x16x128xbf16>
    %27 = vector.shape_cast %26 : vector<8x16x128xbf16> to vector<128x128xbf16>
    %c0_36 = arith.constant 0 : index
    %c256_37 = arith.constant 256 : index
    %28 = vector.load %arg7[%c0_36, %c256_37] : memref<128x384xbf16, #tpu.memory_space<vmem>>, vector<128x128xbf16>
    tpu.vector_store %arg7[%c0_36, %c256_37], %27 {strides = array<i32>} : memref<128x384xbf16, #tpu.memory_space<vmem>>, vector<128x128xbf16>,
    %c0_38 = arith.constant 0 : index
    %c0_39 = arith.constant 0 : index
    %29 = vector.load %arg7[%c0_38, %c0_39] : memref<128x384xbf16, #tpu.memory_space<vmem>>, vector<128x384xbf16>
    %c1_40 = arith.constant 1 : index
    %c0_41 = arith.constant 0 : index
    %c0_42 = arith.constant 0 : index
    %30 = vector.load %arg3[%c1_40, %c0_41, %c0_42] : memref<3x384x128xbf16, #tpu.memory_space<vmem>>, vector<1x384x128xbf16>
    %31 = vector.shape_cast %30 : vector<1x384x128xbf16> to vector<384x128xbf16>
    %cst_43 = arith.constant dense<0.000000e+00> : vector<128x128xf32>
    %32 = tpu.matmul %29, %31, %cst_43 {dimension_numbers = #tpu.dot_dimension_numbers<[1], [0], [0], [1], [0, 0, 1, 1], [], []>} : vector<128x384xbf16>, vector<384x128xbf16>, vector<128x128xf32> -> vector<128x128xf32>
    %c0_44 = arith.constant 0 : index
    %c0_45 = arith.constant 0 : index
    %33 = vector.load %arg8[%c0_44, %c0_45] : memref<128x128xf32, #tpu.memory_space<vmem>>, vector<128x128xf32>
    %34 = arith.addf %33, %32 : vector<128x128xf32>
    %c0_46 = arith.constant 0 : index
    %c0_47 = arith.constant 0 : index
    %35 = vector.load %arg8[%c0_46, %c0_47] : memref<128x128xf32, #tpu.memory_space<vmem>>, vector<128x128xf32>
    tpu.vector_store %arg8[%c0_46, %c0_47], %34 {strides = array<i32>} : memref<128x128xf32, #tpu.memory_space<vmem>>, vector<128x128xf32>,
    %c0_48 = arith.constant 0 : index
    %c2_49 = arith.constant 2 : index
    %c0_50 = arith.constant 0 : index
    %c0_51 = arith.constant 0 : index
    %36 = vector.load %arg2[%c0_48, %c2_49, %c0_50, %c0_51] : memref<1x10x18x128xbf16, #tpu.memory_space<vmem>>, vector<1x8x16x128xbf16>
    %37 = vector.shape_cast %36 : vector<1x8x16x128xbf16> to vector<8x16x128xbf16>
    %38 = vector.shape_cast %37 : vector<8x16x128xbf16> to vector<128x128xbf16>
    %c0_52 = arith.constant 0 : index
    %c0_53 = arith.constant 0 : index
    %39 = vector.load %arg7[%c0_52, %c0_53] : memref<128x384xbf16, #tpu.memory_space<vmem>>, vector<128x128xbf16>
    tpu.vector_store %arg7[%c0_52, %c0_53], %38 {strides = array<i32>} : memref<128x384xbf16, #tpu.memory_space<vmem>>, vector<128x128xbf16>,
    %c0_54 = arith.constant 0 : index
    %c2_55 = arith.constant 2 : index
    %c1_56 = arith.constant 1 : index
    %c0_57 = arith.constant 0 : index
    %40 = vector.load %arg2[%c0_54, %c2_55, %c1_56, %c0_57] : memref<1x10x18x128xbf16, #tpu.memory_space<vmem>>, vector<1x8x16x128xbf16>
    %41 = vector.shape_cast %40 : vector<1x8x16x128xbf16> to vector<8x16x128xbf16>
    %42 = vector.shape_cast %41 : vector<8x16x128xbf16> to vector<128x128xbf16>
    %c0_58 = arith.constant 0 : index
    %c128_59 = arith.constant 128 : index
    %43 = vector.load %arg7[%c0_58, %c128_59] : memref<128x384xbf16, #tpu.memory_space<vmem>>, vector<128x128xbf16>
    tpu.vector_store %arg7[%c0_58, %c128_59], %42 {strides = array<i32>} : memref<128x384xbf16, #tpu.memory_space<vmem>>, vector<128x128xbf16>,
    %c0_60 = arith.constant 0 : index
    %c2_61 = arith.constant 2 : index
    %c2_62 = arith.constant 2 : index
    %c0_63 = arith.constant 0 : index
    %44 = vector.load %arg2[%c0_60, %c2_61, %c2_62, %c0_63] : memref<1x10x18x128xbf16, #tpu.memory_space<vmem>>, vector<1x8x16x128xbf16>
    %45 = vector.shape_cast %44 : vector<1x8x16x128xbf16> to vector<8x16x128xbf16>
    %46 = vector.shape_cast %45 : vector<8x16x128xbf16> to vector<128x128xbf16>
    %c0_64 = arith.constant 0 : index
    %c256_65 = arith.constant 256 : index
    %47 = vector.load %arg7[%c0_64, %c256_65] : memref<128x384xbf16, #tpu.memory_space<vmem>>, vector<128x128xbf16>
    tpu.vector_store %arg7[%c0_64, %c256_65], %46 {strides = array<i32>} : memref<128x384xbf16, #tpu.memory_space<vmem>>, vector<128x128xbf16>,
    %c0_66 = arith.constant 0 : index
    %c0_67 = arith.constant 0 : index
    %48 = vector.load %arg7[%c0_66, %c0_67] : memref<128x384xbf16, #tpu.memory_space<vmem>>, vector<128x384xbf16>
    %c2_68 = arith.constant 2 : index
    %c0_69 = arith.constant 0 : index
    %c0_70 = arith.constant 0 : index
    %49 = vector.load %arg3[%c2_68, %c0_69, %c0_70] : memref<3x384x128xbf16, #tpu.memory_space<vmem>>, vector<1x384x128xbf16>
    %50 = vector.shape_cast %49 : vector<1x384x128xbf16> to vector<384x128xbf16>
    %cst_71 = arith.constant dense<0.000000e+00> : vector<128x128xf32>
    %51 = tpu.matmul %48, %50, %cst_71 {dimension_numbers = #tpu.dot_dimension_numbers<[1], [0], [0], [1], [0, 0, 1, 1], [], []>} : vector<128x384xbf16>, vector<384x128xbf16>, vector<128x128xf32> -> vector<128x128xf32>
    %c0_72 = arith.constant 0 : index
    %c0_73 = arith.constant 0 : index
    %52 = vector.load %arg8[%c0_72, %c0_73] : memref<128x128xf32, #tpu.memory_space<vmem>>, vector<128x128xf32>
    %53 = arith.addf %52, %51 : vector<128x128xf32>
    %c0_74 = arith.constant 0 : index
    %c0_75 = arith.constant 0 : index
    %54 = vector.load %arg8[%c0_74, %c0_75] : memref<128x128xf32, #tpu.memory_space<vmem>>, vector<128x128xf32>
    tpu.vector_store %arg8[%c0_74, %c0_75], %53 {strides = array<i32>} : memref<128x128xf32, #tpu.memory_space<vmem>>, vector<128x128xf32>,
    %c0_76 = arith.constant 0 : index
    %c0_77 = arith.constant 0 : index
    %55 = vector.load %arg8[%c0_76, %c0_77] : memref<128x128xf32, #tpu.memory_space<vmem>>, vector<128x128xf32>
    %56 = vector.shape_cast %55 : vector<128x128xf32> to vector<1x8x16x128xf32>
    %57 = arith.truncf %56 : vector<1x8x16x128xf32> to vector<1x8x16x128xbf16>
    %c0_78 = arith.constant 0 : index
    %c0_79 = arith.constant 0 : index
    %c0_80 = arith.constant 0 : index
    %c0_81 = arith.constant 0 : index
    %58 = vector.load %arg4[%c0_78, %c0_79, %c0_80, %c0_81] : memref<1x8x16x128xbf16, #tpu.memory_space<vmem>>, vector<1x8x16x128xbf16>
    tpu.vector_store %arg4[%c0_78, %c0_79, %c0_80, %c0_81], %57 {strides = array<i32>} : memref<1x8x16x128xbf16, #tpu.memory_space<vmem>>, vector<1x8x16x128xbf16>,
    %cst_82 = arith.constant dense<0.000000e+00> : vector<128xf32>
    %59 = vector.multi_reduction <add>, %55, %cst_82 [0] : vector<128x128xf32> to vector<128xf32>
    %60 = vector.shape_cast %59 : vector<128xf32> to vector<1x1x128xf32>
    %c0_83 = arith.constant 0 : index
    %c0_84 = arith.constant 0 : index
    %c0_85 = arith.constant 0 : index
    %61 = vector.load %arg5[%c0_83, %c0_84, %c0_85] : memref<1x1x128xf32, #tpu.memory_space<vmem>>, vector<1x1x128xf32>
    tpu.vector_store %arg5[%c0_83, %c0_84, %c0_85], %60 {strides = array<i32>} : memref<1x1x128xf32, #tpu.memory_space<vmem>>, vector<1x1x128xf32>,
    %62 = arith.mulf %55, %55 : vector<128x128xf32>
    %cst_86 = arith.constant dense<0.000000e+00> : vector<128xf32>
    %63 = vector.multi_reduction <add>, %62, %cst_86 [0] : vector<128x128xf32> to vector<128xf32>
    %64 = vector.shape_cast %63 : vector<128xf32> to vector<1x1x128xf32>
    %c0_87 = arith.constant 0 : index
    %c0_88 = arith.constant 0 : index
    %c0_89 = arith.constant 0 : index
    %65 = vector.load %arg6[%c0_87, %c0_88, %c0_89] : memref<1x1x128xf32, #tpu.memory_space<vmem>>, vector<1x1x128xf32>
    tpu.vector_store %arg6[%c0_87, %c0_88, %c0_89], %64 {strides = array<i32>} : memref<1x1x128xf32, #tpu.memory_space<vmem>>, vector<1x1x128xf32>,
    return
  }
  func.func @transform_0(%arg0: i32, %arg1: i32) -> (i32, i32, i32, i32) {
    %c2_i32 = arith.constant 2 : i32
    %0 = arith.muli %arg0, %c2_i32 : i32
    %1 = arith.addi %0, %arg1 : i32
    %c0_i32 = arith.constant 0 : i32
    %c0_i32_0 = arith.constant 0 : i32
    %c0_i32_1 = arith.constant 0 : i32
    %c0_i32_2 = arith.constant 0 : i32
    return %1, %c0_i32, %c0_i32_0, %c0_i32_1 : i32, i32, i32, i32
  }
  func.func @transform_1(%arg0: i32, %arg1: i32) -> (i32, i32, i32) {
    %c0_i32 = arith.constant 0 : i32
    %c0_i32_0 = arith.constant 0 : i32
    %c0_i32_1 = arith.constant 0 : i32
    %c0_i32_2 = arith.constant 0 : i32
    return %c0_i32, %c0_i32_0, %c0_i32_1 : i32, i32, i32
  }
  func.func @transform_2(%arg0: i32, %arg1: i32) -> (i32, i32, i32, i32) {
    %c0_i32 = arith.constant 0 : i32
    %c0_i32_0 = arith.constant 0 : i32
    %c0_i32_1 = arith.constant 0 : i32
    return %arg0, %arg1, %c0_i32, %c0_i32_0 : i32, i32, i32, i32
  }
  func.func @transform_3(%arg0: i32, %arg1: i32) -> (i32, i32, i32) {
    %c2_i32 = arith.constant 2 : i32
    %0 = arith.muli %arg0, %c2_i32 : i32
    %1 = arith.addi %0, %arg1 : i32
    %c0_i32 = arith.constant 0 : i32
    %c0_i32_0 = arith.constant 0 : i32
    %c0_i32_1 = arith.constant 0 : i32
    return %1, %c0_i32, %c0_i32_0 : i32, i32, i32
  }
  func.func @transform_4(%arg0: i32, %arg1: i32) -> (i32, i32, i32) {
    %c2_i32 = arith.constant 2 : i32
    %0 = arith.muli %arg0, %c2_i32 : i32
    %1 = arith.addi %0, %arg1 : i32
    %c0_i32 = arith.constant 0 : i32
    %c0_i32_0 = arith.constant 0 : i32
    %c0_i32_1 = arith.constant 0 : i32
    return %1, %c0_i32, %c0_i32_0 : i32, i32, i32
  }
}

module attributes {stable_mosaic.version = 11 : i64} {
  func.func @bn_relu_kernel(%arg0: i32, %arg1: i32, %arg2: memref<1x16x16x128xbf16, #tpu.memory_space<vmem>>, %arg3: memref<1x1x128xf32, #tpu.memory_space<vmem>>, %arg4: memref<1x1x128xf32, #tpu.memory_space<vmem>>, %arg5: memref<1x16x16x128xf32, #tpu.memory_space<vmem>>) attributes {dimension_semantics = [#tpu.dimension_semantics<parallel>, #tpu.dimension_semantics<parallel>], iteration_bounds = array<i64: 2, 1>, scalar_prefetch = 0 : i64, scratch_operands = 0 : i64, tpu.core_type = #tpu.core_type<tc>, window_params = [{transform_indices = @transform_0, window_bounds = array<i64: 1, 16, 16, 128>}, {pipeline_mode = #tpu.pipeline_mode<synchronous>, transform_indices = @transform_1, window_bounds = array<i64: 1, 1, 128>}, {pipeline_mode = #tpu.pipeline_mode<synchronous>, transform_indices = @transform_2, window_bounds = array<i64: 1, 1, 128>}, {transform_indices = @transform_3, window_bounds = array<i64: 1, 16, 16, 128>}]} {
    %c0 = arith.constant 0 : index
    %c0_0 = arith.constant 0 : index
    %c0_1 = arith.constant 0 : index
    %c0_2 = arith.constant 0 : index
    %0 = vector.load %arg2[%c0, %c0_0, %c0_1, %c0_2] : memref<1x16x16x128xbf16, #tpu.memory_space<vmem>>, vector<1x16x16x128xbf16>
    %1 = arith.extf %0 : vector<1x16x16x128xbf16> to vector<1x16x16x128xf32>
    %c0_3 = arith.constant 0 : index
    %c0_4 = arith.constant 0 : index
    %c0_5 = arith.constant 0 : index
    %2 = vector.load %arg3[%c0_3, %c0_4, %c0_5] : memref<1x1x128xf32, #tpu.memory_space<vmem>>, vector<1x1x128xf32>
    %3 = vector.shape_cast %2 : vector<1x1x128xf32> to vector<1x1x1x128xf32>
    %4 = vector.broadcast %3 : vector<1x1x1x128xf32> to vector<1x16x16x128xf32>
    %5 = arith.mulf %1, %4 : vector<1x16x16x128xf32>
    %c0_6 = arith.constant 0 : index
    %c0_7 = arith.constant 0 : index
    %c0_8 = arith.constant 0 : index
    %6 = vector.load %arg4[%c0_6, %c0_7, %c0_8] : memref<1x1x128xf32, #tpu.memory_space<vmem>>, vector<1x1x128xf32>
    %7 = vector.shape_cast %6 : vector<1x1x128xf32> to vector<1x1x1x128xf32>
    %8 = vector.broadcast %7 : vector<1x1x1x128xf32> to vector<1x16x16x128xf32>
    %9 = arith.addf %5, %8 : vector<1x16x16x128xf32>
    %cst = arith.constant 0.000000e+00 : f32
    %10 = vector.broadcast %cst : f32 to vector<1x16x16x128xf32>
    %11 = arith.maximumf %9, %10 : vector<1x16x16x128xf32>
    %c0_9 = arith.constant 0 : index
    %c0_10 = arith.constant 0 : index
    %c0_11 = arith.constant 0 : index
    %c0_12 = arith.constant 0 : index
    %12 = vector.load %arg5[%c0_9, %c0_10, %c0_11, %c0_12] : memref<1x16x16x128xf32, #tpu.memory_space<vmem>>, vector<1x16x16x128xf32>
    tpu.vector_store %arg5[%c0_9, %c0_10, %c0_11, %c0_12], %11 {strides = array<i32>} : memref<1x16x16x128xf32, #tpu.memory_space<vmem>>, vector<1x16x16x128xf32>,
    return
  }
  func.func @transform_0(%arg0: i32, %arg1: i32) -> (i32, i32, i32, i32) {
    %c0_i32 = arith.constant 0 : i32
    %c0_i32_0 = arith.constant 0 : i32
    %c0_i32_1 = arith.constant 0 : i32
    return %arg0, %arg1, %c0_i32, %c0_i32_0 : i32, i32, i32, i32
  }
  func.func @transform_1(%arg0: i32, %arg1: i32) -> (i32, i32, i32) {
    %c0_i32 = arith.constant 0 : i32
    %c0_i32_0 = arith.constant 0 : i32
    %c0_i32_1 = arith.constant 0 : i32
    %c0_i32_2 = arith.constant 0 : i32
    return %c0_i32, %c0_i32_0, %c0_i32_1 : i32, i32, i32
  }
  func.func @transform_2(%arg0: i32, %arg1: i32) -> (i32, i32, i32) {
    %c0_i32 = arith.constant 0 : i32
    %c0_i32_0 = arith.constant 0 : i32
    %c0_i32_1 = arith.constant 0 : i32
    %c0_i32_2 = arith.constant 0 : i32
    return %c0_i32, %c0_i32_0, %c0_i32_1 : i32, i32, i32
  }
  func.func @transform_3(%arg0: i32, %arg1: i32) -> (i32, i32, i32, i32) {
    %c0_i32 = arith.constant 0 : i32
    %c0_i32_0 = arith.constant 0 : i32
    %c0_i32_1 = arith.constant 0 : i32
    return %arg0, %arg1, %c0_i32, %c0_i32_0 : i32, i32, i32, i32
  }
}

</mosaic_0001>

<bundles_post_ra>
// kernel: upernet_conv_module.3
= control target key start
LH: loop header
LB: loop body
LE: loop exit
PB: predicated region body
PF: predicated region fallthrough
CT: control target
= control target key end

     0   :  { %s679_s12 = smov 0   ;;  %s681_s13 = smov 0   ;;  %s842_s0 = inlined_call_operand.vmem [shape: bf16[2,16,16,128], index: 0, kind: input, shape index: {}]   ;;  %s843_s1 = inlined_call_operand.vmem [shape: f32[1,1,128], index: 1, kind: input, shape index: {}]   ;;  %s844_s2 = inlined_call_operand.vmem [shape: f32[1,1,128], index: 2, kind: input, shape index: {}]   ;;  %s845_s3 = inlined_call_operand.vmem [shape: f32[2,16,16,128], index: 3, kind: output, shape index: {}]  }
   0x1   :  { %s683_s14 = smov 0  }
   0x2 LB: > { %s25_s15 = sadd.s32 1, %s653_s13  ;;  %p521_p0 = scmp.ge.s32.totalorder %s657_s14, 1  ;;  %s657_s14 = sphi %s683_s14, %s13_s14   ;;  %s653_s13 = sphi %s681_s13, %s847_s13   ;;  %s649_s12 = sphi %s679_s12, %s846_s12  }
   0x3   : > { %p27_p1 = scmp.ge.s32.totalorder %s25_s15, 2  ;;  %p159_p2 = scmp.lt.s32.totalorder %s657_s14, 3 }
   0x5   : > { %s849_s15 = smov (%p27_p1, %s25_s15), 0  ;;  %p160_p3 = pnand %p521_p0, %p159_p2 }
   0x6   : > { %p194_p4 = scmp.lt.s32.totalorder (!%p160_p3), %s649_s12, 1  ;;  %v708_v0 = vld [vmem:[%s843_s1] ss:$0 sm:$0xff] (!%p160_p3) }
   0x7   : > { %163 = sbr.rel (%p160_p3) target bundleno = 54 (0x36), region = 32  ;;  %v717_v9 = vld [vmem:[%s844_s2] ss:$0 sm:$0xff] (!%p160_p3) }
   0xe   : > { %s851_s12 = smov (!%p194_p4, %s649_s12), 1 }
   0xf   : > { %s530_s16 = sshll.u32 %s851_s12, 7  ;;  %s531_s24 = sshll.u32 %s851_s12, 8 }
  0x10   : > { %s703_s19 = scalar_lea.vmem %s842_s0, %s530_s16  ;;  %s735_s27 = scalar_lea.vmem %s845_s3, %s531_s24 }
  0x11   : > { %v533_v1 = vld [vmem:[%s703_s19] sm:$0xff]   ;;  %v596_v2 = vld [vmem:[%s703_s19 + $0x8] sm:$0xff]   ;;  %v597_v3 = vld [vmem:[%s703_s19 + $0x10] sm:$0xff]  }
  0x12   : > { %v534_v4 = vunpack.c.l.bf16 %v533_v1  ;;  %v535_v5 = vunpack.c.h.bf16 %v533_v1  ;;  %v538_v6 = vunpack.c.l.bf16 %v596_v2  ;;  %v539_v7 = vunpack.c.h.bf16 %v596_v2  ;;  %v598_v8 = vld [vmem:[%s703_s19 + $0x18] sm:$0xff]   ;;  %v599_v30 = vld [vmem:[%s703_s19 + $0x20] sm:$0xff]   ;;  %v600_v31 = vld [vmem:[%s703_s19 + $0x28] sm:$0xff]  }
  0x13   : > { %v542_v10 = vunpack.c.l.bf16 %v597_v3  ;;  %v543_v11 = vunpack.c.h.bf16 %v597_v3  ;;  %v546_v12 = vunpack.c.l.bf16 %v598_v8  ;;  %v547_v13 = vunpack.c.h.bf16 %v598_v8  ;;  %v601_v36 = vld [vmem:[%s703_s19 + $0x30] sm:$0xff]   ;;  %v602_v37 = vld [vmem:[%s703_s19 + $0x38] sm:$0xff]   ;;  %v603_v3 = vld [vmem:[%s703_s19 + $0x40] sm:$0xff]  }
  0x14   : > { %v286_v14 = vmul.f32 %v534_v4, %v708_v0  ;;  %v287_v15 = vmul.f32 %v535_v5, %v708_v0  ;;  %v288_v16 = vmul.f32 %v538_v6, %v708_v0  ;;  %v289_v17 = vmul.f32 %v539_v7, %v708_v0  ;;  %v604_v4 = vld [vmem:[%s703_s19 + $0x48] sm:$0xff]  }
  0x15   : > { %v290_v18 = vmul.f32 %v542_v10, %v708_v0  ;;  %v291_v19 = vmul.f32 %v543_v11, %v708_v0  ;;  %v292_v20 = vmul.f32 %v546_v12, %v708_v0  ;;  %v293_v21 = vmul.f32 %v547_v13, %v708_v0  ;;  %v605_v10 = vld [vmem:[%s703_s19 + $0x50] sm:$0xff]   ;;  %v606_v11 = vld [vmem:[%s703_s19 + $0x58] sm:$0xff]  }
  0x16   : > { %v325_v22 = vadd.f32 %v717_v9, %v286_v14  ;;  %v326_v23 = vadd.f32 %v717_v9, %v287_v15  ;;  %v327_v24 = vadd.f32 %v717_v9, %v288_v16  ;;  %v328_v25 = vadd.f32 %v717_v9, %v289_v17 }
  0x17   : > { %v329_v26 = vadd.f32 %v717_v9, %v290_v18  ;;  %v330_v27 = vadd.f32 %v717_v9, %v291_v19  ;;  %v331_v28 = vadd.f32 %v717_v9, %v292_v20  ;;  %v332_v29 = vadd.f32 %v717_v9, %v293_v21 }
  0x18   : > { %v357_v32 = vmax.f32 %v325_v22, 0.0  ;;  %v358_v33 = vmax.f32 %v326_v23, 0.0  ;;  %v359_v34 = vmax.f32 %v327_v24, 0.0  ;;  %v360_v35 = vmax.f32 %v328_v25, 0.0 }
  0x19   : > { %v361_v38 = vmax.f32 %v329_v26, 0.0  ;;  %v362_v39 = vmax.f32 %v330_v27, 0.0  ;;  %v363_v40 = vmax.f32 %v331_v28, 0.0  ;;  %v364_v41 = vmax.f32 %v332_v29, 0.0 }
  0x1a   : > { %389 = vst [vmem:[%s735_s27] sm:$0xff] %v357_v32  ;;  %390 = vst [vmem:[%s735_s27 + $0x8] sm:$0xff] %v358_v33  ;;  %v550_v42 = vunpack.c.l.bf16 %v599_v30  ;;  %v551_v43 = vunpack.c.h.bf16 %v599_v30  ;;  %v554_v44 = vunpack.c.l.bf16 %v600_v31  ;;  %v555_v45 = vunpack.c.h.bf16 %v600_v31 }
  0x1b   : > { %391 = vst [vmem:[%s735_s27 + $0x10] sm:$0xff] %v359_v34  ;;  %392 = vst [vmem:[%s735_s27 + $0x18] sm:$0xff] %v360_v35  ;;  %v558_v46 = vunpack.c.l.bf16 %v601_v36  ;;  %v559_v47 = vunpack.c.h.bf16 %v601_v36  ;;  %v562_v48 = vunpack.c.l.bf16 %v602_v37  ;;  %v563_v49 = vunpack.c.h.bf16 %v602_v37 }
  0x1c   : > { %393 = vst [vmem:[%s735_s27 + $0x20] sm:$0xff] %v361_v38  ;;  %394 = vst [vmem:[%s735_s27 + $0x28] sm:$0xff] %v362_v39  ;;  %v294_v50 = vmul.f32 %v550_v42, %v708_v0  ;;  %v295_v51 = vmul.f32 %v551_v43, %v708_v0  ;;  %v296_v52 = vmul.f32 %v554_v44, %v708_v0  ;;  %v566_v16 = vunpack.c.l.bf16 %v603_v3 }
  0x1d   : > { %395 = vst [vmem:[%s735_s27 + $0x30] sm:$0xff] %v363_v40  ;;  %396 = vst [vmem:[%s735_s27 + $0x38] sm:$0xff] %v364_v41  ;;  %v297_v53 = vmul.f32 %v555_v45, %v708_v0  ;;  %v298_v54 = vmul.f32 %v558_v46, %v708_v0  ;;  %v299_v55 = vmul.f32 %v559_v47, %v708_v0  ;;  %v567_v17 = vunpack.c.h.bf16 %v603_v3  ;;  %v607_v40 = vld [vmem:[%s703_s19 + $0x60] sm:$0xff]   ;;  %v608_v41 = vld [vmem:[%s703_s19 + $0x68] sm:$0xff]  }
  0x1e   : > { %v300_v56 = vmul.f32 %v562_v48, %v708_v0  ;;  %v301_v57 = vmul.f32 %v563_v49, %v708_v0  ;;  %v333_v58 = vadd.f32 %v717_v9, %v294_v50  ;;  %v334_v59 = vadd.f32 %v717_v9, %v295_v51  ;;  %v609_v46 = vld [vmem:[%s703_s19 + $0x70] sm:$0xff]   ;;  %v610_v47 = vld [vmem:[%s703_s19 + $0x78] sm:$0xff]  }
  0x1f   : > { %v335_v60 = vadd.f32 %v717_v9, %v296_v52  ;;  %v336_v61 = vadd.f32 %v717_v9, %v297_v53  ;;  %v337_v62 = vadd.f32 %v717_v9, %v298_v54  ;;  %v338_v63 = vadd.f32 %v717_v9, %v299_v55 }
  0x20   : > { %v339_v1 = vadd.f32 %v717_v9, %v300_v56  ;;  %v340_v2 = vadd.f32 %v717_v9, %v301_v57  ;;  %v365_v5 = vmax.f32 %v333_v58, 0.0  ;;  %v366_v6 = vmax.f32 %v334_v59, 0.0 }
  0x21   : > { %v367_v7 = vmax.f32 %v335_v60, 0.0  ;;  %v368_v8 = vmax.f32 %v336_v61, 0.0  ;;  %v369_v12 = vmax.f32 %v337_v62, 0.0  ;;  %v370_v13 = vmax.f32 %v338_v63, 0.0 }
  0x22   : > { %v371_v14 = vmax.f32 %v339_v1, 0.0  ;;  %v372_v15 = vmax.f32 %v340_v2, 0.0  ;;  %397 = vst [vmem:[%s735_s27 + $0x40] sm:$0xff] %v365_v5  ;;  %398 = vst [vmem:[%s735_s27 + $0x48] sm:$0xff] %v366_v6  ;;  %v570_v18 = vunpack.c.l.bf16 %v604_v4  ;;  %v571_v19 = vunpack.c.h.bf16 %v604_v4 }
  0x23   : > { %399 = vst [vmem:[%s735_s27 + $0x50] sm:$0xff] %v367_v7  ;;  %400 = vst [vmem:[%s735_s27 + $0x58] sm:$0xff] %v368_v8  ;;  %v574_v20 = vunpack.c.l.bf16 %v605_v10  ;;  %v575_v21 = vunpack.c.h.bf16 %v605_v10  ;;  %v578_v22 = vunpack.c.l.bf16 %v606_v11  ;;  %v579_v23 = vunpack.c.h.bf16 %v606_v11 }
  0x24   : > { %401 = vst [vmem:[%s735_s27 + $0x60] sm:$0xff] %v369_v12  ;;  %402 = vst [vmem:[%s735_s27 + $0x68] sm:$0xff] %v370_v13  ;;  %v302_v24 = vmul.f32 %v566_v16, %v708_v0  ;;  %v303_v25 = vmul.f32 %v567_v17, %v708_v0  ;;  %v304_v26 = vmul.f32 %v570_v18, %v708_v0  ;;  %v582_v52 = vunpack.c.l.bf16 %v607_v40 }
  0x25   : > { %403 = vst [vmem:[%s735_s27 + $0x70] sm:$0xff] %v371_v14  ;;  %404 = vst [vmem:[%s735_s27 + $0x78] sm:$0xff] %v372_v15  ;;  %v305_v27 = vmul.f32 %v571_v19, %v708_v0  ;;  %v306_v28 = vmul.f32 %v574_v20, %v708_v0  ;;  %v307_v29 = vmul.f32 %v575_v21, %v708_v0  ;;  %v583_v53 = vunpack.c.h.bf16 %v607_v40 }
  0x26   : > { %v308_v30 = vmul.f32 %v578_v22, %v708_v0  ;;  %v309_v31 = vmul.f32 %v579_v23, %v708_v0  ;;  %v341_v32 = vadd.f32 %v717_v9, %v302_v24  ;;  %v342_v33 = vadd.f32 %v717_v9, %v303_v25 }
  0x27   : > { %v343_v34 = vadd.f32 %v717_v9, %v304_v26  ;;  %v344_v35 = vadd.f32 %v717_v9, %v305_v27  ;;  %v345_v36 = vadd.f32 %v717_v9, %v306_v28  ;;  %v346_v37 = vadd.f32 %v717_v9, %v307_v29 }
  0x28   : > { %v347_v38 = vadd.f32 %v717_v9, %v308_v30  ;;  %v348_v39 = vadd.f32 %v717_v9, %v309_v31  ;;  %v373_v42 = vmax.f32 %v341_v32, 0.0  ;;  %v374_v43 = vmax.f32 %v342_v33, 0.0 }
  0x29   : > { %v375_v44 = vmax.f32 %v343_v34, 0.0  ;;  %v376_v45 = vmax.f32 %v344_v35, 0.0  ;;  %v377_v48 = vmax.f32 %v345_v36, 0.0  ;;  %v378_v49 = vmax.f32 %v346_v37, 0.0 }
  0x2a   : > { %v379_v50 = vmax.f32 %v347_v38, 0.0  ;;  %v380_v51 = vmax.f32 %v348_v39, 0.0  ;;  %405 = vst [vmem:[%s735_s27 + $0x80] sm:$0xff] %v373_v42  ;;  %406 = vst [vmem:[%s735_s27 + $0x88] sm:$0xff] %v374_v43  ;;  %v586_v54 = vunpack.c.l.bf16 %v608_v41  ;;  %v587_v55 = vunpack.c.h.bf16 %v608_v41 }
  0x2b   : > { %407 = vst [vmem:[%s735_s27 + $0x90] sm:$0xff] %v375_v44  ;;  %408 = vst [vmem:[%s735_s27 + $0x98] sm:$0xff] %v376_v45  ;;  %v590_v56 = vunpack.c.l.bf16 %v609_v46  ;;  %v591_v57 = vunpack.c.h.bf16 %v609_v46  ;;  %v594_v58 = vunpack.c.l.bf16 %v610_v47  ;;  %v595_v59 = vunpack.c.h.bf16 %v610_v47 }
  0x2c   : > { %409 = vst [vmem:[%s735_s27 + $0xa0] sm:$0xff] %v377_v48  ;;  %410 = vst [vmem:[%s735_s27 + $0xa8] sm:$0xff] %v378_v49  ;;  %v310_v60 = vmul.f32 %v582_v52, %v708_v0  ;;  %v311_v61 = vmul.f32 %v583_v53, %v708_v0  ;;  %v312_v62 = vmul.f32 %v586_v54, %v708_v0 }
  0x2d   : > { %411 = vst [vmem:[%s735_s27 + $0xb0] sm:$0xff] %v379_v50  ;;  %412 = vst [vmem:[%s735_s27 + $0xb8] sm:$0xff] %v380_v51  ;;  %v313_v63 = vmul.f32 %v587_v55, %v708_v0  ;;  %v314_v1 = vmul.f32 %v590_v56, %v708_v0  ;;  %v315_v2 = vmul.f32 %v591_v57, %v708_v0 }
  0x2e   : > { %v316_v3 = vmul.f32 %v594_v58, %v708_v0  ;;  %v317_v4 = vmul.f32 %v595_v59, %v708_v0  ;;  %v349_v5 = vadd.f32 %v717_v9, %v310_v60  ;;  %v350_v6 = vadd.f32 %v717_v9, %v311_v61 }
  0x2f   : > { %v351_v7 = vadd.f32 %v717_v9, %v312_v62  ;;  %v352_v8 = vadd.f32 %v717_v9, %v313_v63  ;;  %v353_v10 = vadd.f32 %v717_v9, %v314_v1  ;;  %v354_v11 = vadd.f32 %v717_v9, %v315_v2 }
  0x30   : > { %v355_v0 = vadd.f32 %v717_v9, %v316_v3  ;;  %v356_v12 = vadd.f32 %v717_v9, %v317_v4  ;;  %v381_v13 = vmax.f32 %v349_v5, 0.0  ;;  %v382_v14 = vmax.f32 %v350_v6, 0.0 }
  0x31   : > { %v383_v15 = vmax.f32 %v351_v7, 0.0  ;;  %v384_v16 = vmax.f32 %v352_v8, 0.0  ;;  %v385_v17 = vmax.f32 %v353_v10, 0.0  ;;  %v386_v18 = vmax.f32 %v354_v11, 0.0 }
  0x32   : > { %v387_v19 = vmax.f32 %v355_v0, 0.0  ;;  %v388_v20 = vmax.f32 %v356_v12, 0.0  ;;  %413 = vst [vmem:[%s735_s27 + $0xc0] sm:$0xff] %v381_v13  ;;  %414 = vst [vmem:[%s735_s27 + $0xc8] sm:$0xff] %v382_v14 }
  0x33   : > { %415 = vst [vmem:[%s735_s27 + $0xd0] sm:$0xff] %v383_v15  ;;  %416 = vst [vmem:[%s735_s27 + $0xd8] sm:$0xff] %v384_v16 }
  0x34   : > { %417 = vst [vmem:[%s735_s27 + $0xe0] sm:$0xff] %v385_v17  ;;  %418 = vst [vmem:[%s735_s27 + $0xe8] sm:$0xff] %v386_v18 }
  0x35   : > { %419 = vst [vmem:[%s735_s27 + $0xf0] sm:$0xff] %v387_v19  ;;  %420 = vst [vmem:[%s735_s27 + $0xf8] sm:$0xff] %v388_v20 }
  0x36 PF: > { %s13_s14 = sadd.s32 1, %s657_s14   ;;  %s846_s12 = smov %s653_s13 }
  0x37   : > { %p10_p5 = scmp.ge.s32.totalorder %s13_s14, 4   ;;  %s847_s13 = smov %s849_s15 }
  0x39   :  { %12 = sbr.rel (!%p10_p5) target bundleno = 2 (0x2), region = 62 }

// kernel: upernet_conv_module.2
= control target key start
LH: loop header
LB: loop body
LE: loop exit
PB: predicated region body
PF: predicated region fallthrough
CT: control target
= control target key end

     0   :  { %s4477_s15 = smov 0   ;;  %s4479_s16 = smov 0   ;;  %s5283_s0 = inlined_call_operand.vmem [shape: bf16[4,10,18,128], index: 0, kind: input, shape index: {}]   ;;  %s5284_s1 = inlined_call_operand.vmem [shape: bf16[3,384,128], index: 1, kind: input, shape index: {}]   ;;  %s5285_s2 = inlined_call_operand.vmem [shape: bf16[2,16,16,128], index: 2, kind: output, shape index: {0}]   ;;  %s5286_s3 = inlined_call_operand.vmem [shape: f32[4,1,128], index: 3, kind: output, shape index: {1}]   ;;  %s5287_s4 = inlined_call_operand.vmem [shape: f32[4,1,128], index: 4, kind: output, shape index: {2}]  }
   0x1   :  { %s4481_s17 = smov 0   ;;  %s4483_s18 = smov 0  }
   0x2   :  { %s4485_s19 = smov 0  }
   0x3 LB: > { %s24_s20 = sadd.s32 1, %s4442_s17  ;;  %s27_s21 = sadd.s32 1, %s4446_s18  ;;  %s4450_s19 = sphi %s4485_s19, %s15_s19   ;;  %s4446_s18 = sphi %s4483_s18, %s5295_s18   ;;  %s4442_s17 = sphi %s4481_s17, %s5294_s17   ;;  %s4438_s16 = sphi %s4479_s16, %s5293_s16   ;;  %s4434_s15 = sphi %s4477_s15, %s5292_s15  }
   0x4   : > { %p25_p0 = scmp.ge.s32.totalorder %s24_s20, 2  ;;  %p3361_p1 = scmp.ge.s32.totalorder %s4450_s19, 1 }
   0x5   : > { %p197_p2 = scmp.lt.s32.totalorder %s4450_s19, 5 }
   0x6   : > { %s5297_s20 = smov (%p25_p0, %s24_s20), 0  ;;  %s5299_s21 = smov (!%p25_p0, %s27_s21), %s4446_s18 }
   0x7   : > { %p198_p3 = pnand %p3361_p1, %p197_p2  ;;  %p29_p4 = scmp.ge.s32.totalorder %s5299_s21, 2 }
   0x8   : > { %v4316_v0 = vld [vmem:[%s5284_s1 + $0x40] sm:$0xff] (!%p198_p3)   ;;  %v4319_v3 = vld [vmem:[%s5284_s1 + $0x48] sm:$0xff] (!%p198_p3)   ;;  %s3362_s30 = sshll.u32 (!%p198_p3), %s4438_s16, 1  ;;  %v4322_v6 = vld [vmem:[%s5284_s1 + $0x50] sm:$0xff] (!%p198_p3)   ;;  %vm654_vm0 = vcmask (!%p198_p3), 1042432   ;;  %vm655_vm1 = vcmask (!%p198_p3), 1046532  }
   0x9   : > { %s5301_s21 = smov (%p29_p4, %s5299_s21), 0  ;;  %201 = sbr.rel (%p198_p3) target bundleno = 436 (0x1b4), region = 28 }
   0xa   : > { %v4317_v1 = vld [vmem:[%s5284_s1 + $0x80] sm:$0xff] (!%p198_p3)   ;;  %3843 = vmatprep.subr.bf16.mxu0 (!%p198_p3), %v4316_v0  ;;  %v4320_v4 = vld [vmem:[%s5284_s1 + $0x88] sm:$0xff] (!%p198_p3)   ;;  %s241_s11 = sadd.s32 (!%p198_p3), %s4434_s15, %s3362_s30  ;;  %v4323_v7 = vld [vmem:[%s5284_s1 + $0x90] sm:$0xff] (!%p198_p3)   ;;  %vm371_vm2 = vsmask.f32 (!%p198_p3), 3328  ;;  %p250_p6 = scmp.lt.s32.totalorder (!%p198_p3), %s4438_s16, 1 }
   0xb   : > { %v4318_v2 = vld [vmem:[%s5284_s1] sm:$0xff] (!%p198_p3)   ;;  %4083 = vmatprep.subr.bf16.mxu1 (!%p198_p3), %v4317_v1  ;;  %v4321_v5 = vld [vmem:[%s5284_s1 + $0x8] sm:$0xff] (!%p198_p3)   ;;  %v4324_v8 = vld [vmem:[%s5284_s1 + $0x10] sm:$0xff] (!%p198_p3)   ;;  %p242_p5 = scmp.lt.s32.totalorder (!%p198_p3), %s241_s11, 3  ;;  %vm372_vm3 = vsmask.f32 (!%p198_p3), 7440 }
   0xc   : > { %3844 = vmatpush3.bf16.msra.mxu0 (!%p198_p3), %v4318_v2  ;;  %4084 = vmatpush3.bf16.msra.mxu1 (!%p198_p3), %v4317_v1  ;;  %v4325_v9 = vld [vmem:[%s5284_s1 + $0x58] sm:$0xff] (!%p198_p3)   ;;  %v4328_v12 = vld [vmem:[%s5284_s1 + $0x60] sm:$0xff] (!%p198_p3)   ;;  %v4331_v15 = vld [vmem:[%s5284_s1 + $0x68] sm:$0xff] (!%p198_p3)  }
   0xd   : > { %3845 = vmatprep.subr.bf16.mxu0 (!%p198_p3), %v4319_v3  ;;  %4085 = vmatprep.subr.bf16.mxu1 (!%p198_p3), %v4320_v4  ;;  %v4326_v10 = vld [vmem:[%s5284_s1 + $0x98] sm:$0xff] (!%p198_p3)   ;;  %v4329_v13 = vld [vmem:[%s5284_s1 + $0xa0] sm:$0xff] (!%p198_p3)   ;;  %v4332_v16 = vld [vmem:[%s5284_s1 + $0xa8] sm:$0xff] (!%p198_p3)  }
   0xe   : > { %v4327_v11 = vld [vmem:[%s5284_s1 + $0x18] sm:$0xff] (!%p198_p3)   ;;  %v4330_v14 = vld [vmem:[%s5284_s1 + $0x20] sm:$0xff] (!%p198_p3)   ;;  %v4333_v17 = vld [vmem:[%s5284_s1 + $0x28] sm:$0xff] (!%p198_p3)  }
   0xf   : > { %v4334_v18 = vld [vmem:[%s5284_s1 + $0x70] sm:$0xff] (!%p198_p3)   ;;  %v4337_v21 = vld [vmem:[%s5284_s1 + $0x78] sm:$0xff] (!%p198_p3)   ;;  %vm4601_vm4 = vmor (!%p198_p3), %vm654_vm0, %vm655_vm1 }
  0x10   : > { %3846 = vmatpush3.bf16.msra.mxu0 %v4321_v5  ;;  %4086 = vmatpush3.bf16.msra.mxu1 %v4320_v4  ;;  %s5303_s11 = smov (!%p242_p5, %s241_s11), 3  ;;  %v4335_v19 = vld [vmem:[%s5284_s1 + $0xb0] sm:$0xff]   ;;  %v4338_v22 = vld [vmem:[%s5284_s1 + $0xb8] sm:$0xff]   ;;  %vm4607_vm5 = vmor %vm371_vm2, %vm372_vm3  ;;  %s5305_s16 = smov (!%p250_p6, %s4438_s16), 1 }
  0x11   : > { %3847 = vmatprep.subr.bf16.mxu0 %v4322_v6  ;;  %4087 = vmatprep.subr.bf16.mxu1 %v4323_v7  ;;  %s4275_s14 = smul.u32 120, %s5303_s11  ;;  %v4336_v20 = vld [vmem:[%s5284_s1 + $0x30] sm:$0xff]   ;;  %v4339_v28 = vld [vmem:[%s5284_s1 + $0x38] sm:$0xff]   ;;  %v4341_v51 = vld [vmem:[%s5284_s1 + $0x100] sm:$0xff]   ;;  %s3366_s7 = sshll.u32 %s5305_s16, 5 }
  0x12   : > { %v4342_v56 = vld [vmem:[%s5284_s1 + $0x1c0] sm:$0xff]   ;;  %s264_s22 = scalar_lea.vmem %s5286_s3, %s5303_s11  ;;  %s271_s25 = scalar_lea.vmem %s5287_s4, %s5303_s11 }
  0x13   : > { %s4579_s30 = scalar_lea.vmem %s5283_s0, %s4275_s14  ;;  %v4343_v0 = vld [vmem:[%s5284_s1 + $0xc0] sm:$0xff]  }
  0x14   : > { %3848 = vmatpush3.bf16.msra.mxu0 %v4324_v8  ;;  %4088 = vmatpush3.bf16.msra.mxu1 %v4323_v7  ;;  %v347_v23 = vld [vmem:[%s4579_s30] sm:$0xf]  ;;  %v348_v24 = vld [vmem:[%s4579_s30 + $0x4] sm:$0xf]  ;;  %v349_v25 = vld [vmem:[%s4579_s30 + $0x8] sm:$0x1] }
  0x15   : > { %3849 = vmatprep.subr.bf16.mxu0 %v4325_v9  ;;  %4089 = vmatprep.subr.bf16.mxu1 %v4326_v10  ;;  %v375_v26 = vshrl.u32 %v347_v23, 16  ;;  %v378_v27 = vshll.u32 %v347_v23, 16  ;;  %v384_v29 = vshll.u32 %v348_v24, 16  ;;  %v388_v30 = vshrl.u32 %v348_v24, 16  ;;  %v606_v32 = vld [vmem:[%s4579_s30] sm:$0xe] }
  0x16   : > { %v394_v31 = vshll.u32 %v349_v25, 16  ;;  %v607_v35 = vld [vmem:[%s4579_s30 + $0x4] sm:$0xf]  ;;  %v608_v36 = vld [vmem:[%s4579_s30 + $0x8] sm:$0x1]  ;;  %v3386_v41 = vrot.slane %v606_v32, 9 }
  0x17   : > { %v377_v33 = vrot.slane %v375_v26, 4  ;;  %v380_v34 = vrot.slane %v378_v27, 5  ;;  %v386_v37 = vrot.slane %v384_v29, 5  ;;  %v390_v38 = vrot.slane %v388_v30, 4  ;;  %v609_v46 = vld [vmem:[%s4579_s30 + $0xc] sm:$0xe] }
  0x18   : > { %3850 = vmatpush3.bf16.msra.mxu0 %v4327_v11  ;;  %4090 = vmatpush3.bf16.msra.mxu1 %v4326_v10  ;;  %v396_v39 = vrot.slane %v394_v31, 5  ;;  %v659_v44 = vrot.slane %v607_v35, 5  ;;  %v662_v45 = vrot.slane %v608_v36, 5  ;;  %v610_v48 = vld [vmem:[%s4579_s30 + $0x10] sm:$0xf]  ;;  %v3387_v50 = vrot.slane %v609_v46, 9 }
  0x19   : > { %3851 = vmatprep.subr.bf16.mxu0 %v4328_v12  ;;  %4091 = vmatprep.subr.bf16.mxu1 %v4329_v13  ;;  %v381_v43 = vor.u32 %v380_v34, %v377_v33  ;;  %v391_v47 = vor.u32 %v390_v38, %v386_v37  ;;  %v611_v49 = vld [vmem:[%s4579_s30 + $0x14] sm:$0x1]  ;;  %v666_v55 = vrot.slane %v610_v48, 5  ;;  %v4340_v58 = vld [vmem:[%s4579_s30] sm:$0xff]   ;;  %v4345_v7 = vld [vmem:[%s5284_s1 + $0x108] sm:$0xff]  }
  0x1a   : > { %v660_v53 = vsel %vm4601_vm4, %v3386_v41, %v659_v44  ;;  %v661_v54 = vrot.slane %v659_v44, 4  ;;  %v669_v59 = vrot.slane %v611_v49, 5  ;;  %v4344_v5 = vld [vmem:[%s5284_s1 + $0x180] sm:$0xff]   ;;  %v350_v8 = vld [vmem:[%s4579_s30 + $0xc] sm:$0xf]  ;;  %v4350_v48 = vld [vmem:[%s5284_s1 + $0xd0] sm:$0xff]  }
  0x1b   : > { %v382_v52 = vrot.slane %v381_v43, 4  ;;  %v392_v57 = vrot.slane %v391_v47, 4  ;;  %v667_v62 = vsel %vm4601_vm4, %v3387_v50, %v666_v55  ;;  %v668_v63 = vrot.slane %v666_v55, 4  ;;  %v351_v9 = vld [vmem:[%s4579_s30 + $0x10] sm:$0xf]  ;;  %v4349_v44 = vld [vmem:[%s5284_s1 + $0x1c8] sm:$0xff]  }
  0x1c   : > { %3852 = vmatpush3.bf16.msra.mxu0 %v4330_v14  ;;  %4092 = vmatpush3.bf16.msra.mxu1 %v4329_v13  ;;  %v663_v61 = vsel %vm4601_vm4, %v661_v54, %v662_v45  ;;  %v352_v10 = vld [vmem:[%s4579_s30 + $0x14] sm:$0x1]  ;;  %v399_v11 = vshrl.u32 %v350_v8, 16  ;;  %v402_v12 = vshll.u32 %v350_v8, 16  ;;  %v408_v13 = vshll.u32 %v351_v9, 16  ;;  %v4347_v41 = vld [vmem:[%s4579_s30 + $0xc] sm:$0xff]  }
  0x1d   : > { %3853 = vmatprep.subr.bf16.mxu0 %v4331_v15  ;;  %4093 = vmatprep.subr.bf16.mxu1 %v4332_v16  ;;  %v387_v60 = vsel %vm4607_vm5, %v382_v52, %v386_v37  ;;  %v397_v1 = vsel %vm4607_vm5, %v392_v57, %v396_v39  ;;  %v3394_v2 = vcombine.low %v660_v53, %v663_v61  ;;  %v412_v14 = vshrl.u32 %v351_v9, 16  ;;  %v4346_v15 = vld [vmem:[%s5284_s1 + $0xc8] sm:$0xff]   ;;  %v614_v23 = vld [vmem:[%s4579_s30 + $0x20] sm:$0x1]  ;;  %v615_v30 = vld [vmem:[%s4579_s30 + $0x24] sm:$0xe] }
  0x1e   : > { %v3378_v3 = vcombine.low %v387_v60, %v397_v1  ;;  %v670_v4 = vsel %vm4601_vm4, %v668_v63, %v669_v59  ;;  %v676_v27 = vrot.slane %v614_v23, 5  ;;  %v616_v31 = vld [vmem:[%s4579_s30 + $0x28] sm:$0xf]  ;;  %v617_v34 = vld [vmem:[%s4579_s30 + $0x2c] sm:$0x1]  ;;  %v3389_v35 = vrot.slane %v615_v30, 9 }
  0x1f   : > { %4099 = vmatprep.mubr.bf16.mxu1 %v3394_v2  ;;  %v3395_v6 = vcombine.low %v667_v62, %v670_v4  ;;  %v680_v36 = vrot.slane %v616_v31, 5  ;;  %v4348_v37 = vld [vmem:[%s5284_s1 + $0x110] sm:$0xff]   ;;  %v683_v43 = vrot.slane %v617_v34, 5  ;;  %v4351_v54 = vld [vmem:[%s5284_s1 + $0x188] sm:$0xff]   ;;  %v4353_v57 = vld [vmem:[%s5284_s1 + $0xd8] sm:$0xff]  }
  0x20   : > { %3854 = vmatpush3.bf16.msra.mxu0 %v4333_v17  ;;  %4094 = vmatpush3.bf16.msra.mxu1 %v4332_v16  ;;  %v418_v16 = vshll.u32 %v352_v10, 16  ;;  %v612_v17 = vld [vmem:[%s4579_s30 + $0x18] sm:$0xe]  ;;  %v354_v59 = vld [vmem:[%s4579_s30 + $0x1c] sm:$0xf]  ;;  %v4357_v31 = vld [vmem:[%s5284_s1 + $0xe0] sm:$0xff]  }
  0x21   : > { %3855 = vmatprep.subr.bf16.mxu0 %v4334_v18  ;;  %4095 = vmatprep.subr.bf16.mxu1 %v4335_v19  ;;  %v613_v18 = vld [vmem:[%s4579_s30 + $0x1c] sm:$0xf]  ;;  %v3388_v25 = vrot.slane %v612_v17, 9  ;;  %v681_v46 = vsel %vm4601_vm4, %v3389_v35, %v680_v36  ;;  %v682_v47 = vrot.slane %v680_v36, 4  ;;  %v355_v60 = vld [vmem:[%s4579_s30 + $0x20] sm:$0x1] }
  0x22   : > { %1001 = vmatprep.mubr.bf16.mxu0 %v3378_v3  ;;  %v420_v24 = vrot.slane %v418_v16, 5  ;;  %v673_v26 = vrot.slane %v613_v18, 5  ;;  %v432_v63 = vshll.u32 %v354_v59, 16  ;;  %v618_v1 = vld [vmem:[%s4579_s30 + $0x30] sm:$0xe]  ;;  %v442_v2 = vshll.u32 %v355_v60, 16 }
  0x23   : > { %v684_v53 = vsel %vm4601_vm4, %v682_v47, %v683_v43  ;;  %v619_v3 = vld [vmem:[%s4579_s30 + $0x34] sm:$0xf]  ;;  %v620_v4 = vld [vmem:[%s4579_s30 + $0x38] sm:$0x1]  ;;  %v622_v16 = vld [vmem:[%s4579_s30 + $0x40] sm:$0xf] }
  0x24   : > { %3856 = vmatpush3.bf16.msra.mxu0 %v4336_v20  ;;  %4096 = vmatpush3.bf16.msra.mxu1 %v4335_v19  ;;  %v401_v19 = vrot.slane %v399_v11, 4  ;;  %v404_v20 = vrot.slane %v402_v12, 5  ;;  %v674_v32 = vsel %vm4601_vm4, %v3388_v25, %v673_v26  ;;  %v675_v33 = vrot.slane %v673_v26, 4  ;;  %v623_v17 = vld [vmem:[%s4579_s30 + $0x44] sm:$0x1]  ;;  %v4354_v25 = vld [vmem:[%s4579_s30 + $0x18] sm:$0xff]  }
  0x25   : > { %3857 = vmatprep.subr.bf16.mxu0 %v4337_v21  ;;  %4097 = vmatprep.subr.bf16.mxu1 %v4338_v22  ;;  %v410_v21 = vrot.slane %v408_v13, 5  ;;  %v3397_v55 = vcombine.low %v681_v46, %v684_v53  ;;  %v434_v8 = vrot.slane %v432_v63, 5  ;;  %v444_v10 = vrot.slane %v442_v2, 5  ;;  %v356_v43 = vld [vmem:[%s4579_s30 + $0x24] sm:$0xf] }
  0x26   : > { %v677_v45 = vsel %vm4601_vm4, %v675_v33, %v676_v27  ;;  %v687_v11 = vrot.slane %v619_v3, 5  ;;  %v690_v12 = vrot.slane %v620_v4, 5  ;;  %v697_v26 = vrot.slane %v623_v17, 5  ;;  %v4356_v27 = vld [vmem:[%s5284_s1 + $0x1d0] sm:$0xff]   ;;  %v629_v2 = vld [vmem:[%s4579_s30 + $0x5c] sm:$0x1] }
  0x27   : > { %v447_v46 = vshrl.u32 %v356_v43, 16  ;;  %v450_v47 = vshll.u32 %v356_v43, 16  ;;  %v627_v63 = vld [vmem:[%s4579_s30 + $0x54] sm:$0xe]  ;;  %v3656_v42 = vld [vmem:[%s4579_s30 + $0x30] sm:$0xe] }
  0x28   : > { %3858 = vmatpush3.bf16.msra.mxu0 %v4339_v28  ;;  %4098 = vmatpush3.bf16.msra.mxu1 %v4338_v22  ;;  %v414_v22 = vrot.slane %v412_v14, 4  ;;  %v405_v28 = vor.u32 %v404_v20, %v401_v19  ;;  %v689_v19 = vrot.slane %v687_v11, 4  ;;  %v3393_v3 = vrot.slane %v627_v63, 9  ;;  %v4362_v4 = vld [vmem:[%s5284_s1 + $0x130] sm:$0xff]  }
  0x29   : > { %3923 = vmatprep.subr.bf16.mxu1 %v4341_v51  ;;  %4003 = vmatprep.subr.bf16.mxu0 %v4342_v56  ;;  %v3396_v51 = vcombine.low %v674_v32, %v677_v45  ;;  %v4352_v56 = vld [vmem:[%s5284_s1 + $0x118] sm:$0xff]   ;;  %v358_v45 = vld [vmem:[%s4579_s30 + $0x2c] sm:$0x1]  ;;  %v452_v53 = vrot.slane %v450_v47, 5  ;;  %v4364_v17 = vld [vmem:[%s5284_s1 + $0xf0] sm:$0xff]  }
  0x2a   : > { %v415_v29 = vor.u32 %v414_v22, %v410_v21  ;;  %v406_v38 = vrot.slane %v405_v28, 4  ;;  %v4355_v22 = vld [vmem:[%s5284_s1 + $0x120] sm:$0xff]   ;;  %v691_v28 = vsel %vm4601_vm4, %v689_v19, %v690_v12  ;;  %v711_v12 = vrot.slane %v629_v2, 5 }
  0x2b   : > { %1002 = vmatmul.mubr.bf16.vlgmr.msra.gmra.mrb[0].mxu0 %v4340_v58  ;;  %4100 = vmatmul.mubr.bf16.vlgmr.msra.gmra.mrb[0].mxu1 %v3395_v6  ;;  %v353_v58 = vld [vmem:[%s4579_s30 + $0x18] sm:$0xf] }
  0x2c   : > { %3924 = vmatpush3.bf16.msra.mxu1 %v4343_v0  ;;  %4004 = vmatpush3.bf16.msra.mxu0 %v4344_v5  ;;  %v416_v39 = vrot.slane %v415_v29, 4  ;;  %v411_v49 = vsel %vm4607_vm5, %v406_v38, %v410_v21  ;;  %v423_v61 = vshrl.u32 %v353_v58, 16  ;;  %v426_v62 = vshll.u32 %v353_v58, 16 }
  0x2d   : > { %3925 = vmatprep.subr.bf16.mxu1 %v4345_v7  ;;  %4005 = vmatprep.subr.bf16.mxu0 %v4349_v44  ;;  %v436_v0 = vshrl.u32 %v354_v59, 16  ;;  %v3390_v5 = vrot.slane %v618_v1, 9  ;;  %v694_v21 = vrot.slane %v622_v16, 5  ;;  %v357_v44 = vld [vmem:[%s4579_s30 + $0x28] sm:$0xf] }
  0x2e   : > { %v421_v50 = vsel %vm4607_vm5, %v416_v39, %v420_v24  ;;  %4103 = vmatprep.mubr.bf16.mxu1 %v3396_v51  ;;  %v425_v6 = vrot.slane %v423_v61, 4  ;;  %v428_v7 = vrot.slane %v426_v62, 5  ;;  %v4359_v39 = vld [vmem:[%s5284_s1 + $0x128] sm:$0xff]   ;;  %v628_v1 = vld [vmem:[%s4579_s30 + $0x58] sm:$0xf] }
  0x2f   : > { %v3379_v52 = vcombine.low %v411_v49, %v421_v50  ;;  %v438_v9 = vrot.slane %v436_v0, 4  ;;  %v688_v18 = vsel %vm4601_vm4, %v3390_v5, %v687_v11  ;;  %v696_v30 = vrot.slane %v694_v21, 4  ;;  %v624_v51 = vld [vmem:[%s4579_s30 + $0x48] sm:$0xe] }
  0x30   : > { %3926 = vmatpush3.bf16.msra.mxu1 %v4346_v15  ;;  %4006 = vmatpush3.bf16.msra.mxu0 %v4351_v54  ;;  %v429_v13 = vor.u32 %v428_v7, %v425_v6  ;;  %v621_v15 = vld [vmem:[%s4579_s30 + $0x3c] sm:$0xe]  ;;  %v3398_v34 = vcombine.low %v688_v18, %v691_v28  ;;  %v460_v49 = vshrl.u32 %v357_v44, 16  ;;  %v466_v50 = vshll.u32 %v358_v45, 16  ;;  %v625_v54 = vld [vmem:[%s4579_s30 + $0x4c] sm:$0xf] }
  0x31   : > { %3927 = vmatprep.subr.bf16.mxu1 %v4348_v37  ;;  %1009 = vmatprep.mubr.bf16.mxu0 %v3379_v52  ;;  %v439_v14 = vor.u32 %v438_v9, %v434_v8  ;;  %v3391_v20 = vrot.slane %v621_v15, 9  ;;  %v698_v36 = vsel %vm4601_vm4, %v696_v30, %v697_v26  ;;  %v4358_v37 = vld [vmem:[%s5284_s1 + $0x190] sm:$0xff]   ;;  %v449_v52 = vrot.slane %v447_v46, 4  ;;  %v4363_v9 = vld [vmem:[%s5284_s1 + $0x1d8] sm:$0xff]   ;;  %v4361_v11 = vld [vmem:[%s4579_s30 + $0x24] sm:$0xff]  }
  0x32   : > { %v430_v23 = vrot.slane %v429_v13, 4  ;;  %4007 = vmatprep.subr.bf16.mxu0 %v4356_v27  ;;  %v468_v58 = vrot.slane %v466_v50, 5  ;;  %v3392_v59 = vrot.slane %v624_v51, 9  ;;  %v701_v61 = vrot.slane %v625_v54, 5  ;;  %v359_v26 = vld [vmem:[%s4579_s30 + $0x30] sm:$0xf] }
  0x33   : > { %1010 = vmatmul.mubr.bf16.gmra.mrb[4].mxu0 %v4347_v41  ;;  %4104 = vmatmul.mubr.bf16.gmra.mrb[4].mxu1 %v3397_v55  ;;  %v440_v24 = vrot.slane %v439_v14, 4  ;;  %v695_v29 = vsel %vm4601_vm4, %v3391_v20, %v694_v21  ;;  %v4360_v41 = vld [vmem:[%s5284_s1 + $0xe8] sm:$0xff]   ;;  %v626_v55 = vld [vmem:[%s4579_s30 + $0x50] sm:$0x1]  ;;  %v453_v60 = vor.u32 %v452_v53, %v449_v52  ;;  %v360_v27 = vld [vmem:[%s4579_s30 + $0x34] sm:$0xf] }
  0x34   : > { %3928 = vmatpush3.bf16.msra.mxu1 %v4350_v48  ;;  %v435_v32 = vsel %vm4607_vm5, %v430_v23, %v434_v8  ;;  %4107 = vmatprep.mubr.bf16.mxu1 %v3398_v34  ;;  %v3399_v38 = vcombine.low %v695_v29, %v698_v36  ;;  %v456_v48 = vshll.u32 %v357_v44, 16  ;;  %v704_v62 = vrot.slane %v626_v55, 5  ;;  %v361_v28 = vld [vmem:[%s4579_s30 + $0x38] sm:$0x1]  ;;  %v3450_v34 = vld [vmem:[%s4579_s30 + $0xc] sm:$0xf] }
  0x35   : > { %3929 = vmatprep.subr.bf16.mxu1 %v4352_v56  ;;  %v445_v33 = vsel %vm4607_vm5, %v440_v24, %v444_v10  ;;  %4008 = vmatpush3.bf16.msra.mxu0 %v4358_v37  ;;  %v454_v5 = vrot.slane %v453_v60, 4  ;;  %v702_v6 = vsel %vm4601_vm4, %v3392_v59, %v701_v61  ;;  %v703_v7 = vrot.slane %v701_v61, 4  ;;  %v4366_v24 = vld [vmem:[%s5284_s1 + $0x138] sm:$0xff]   ;;  %v4370_v59 = vld [vmem:[%s5284_s1 + $0x1e0] sm:$0xff]  }
  0x36   : > { %v3380_v35 = vcombine.low %v435_v32, %v445_v33  ;;  %v458_v56 = vrot.slane %v456_v48, 5  ;;  %v708_v8 = vrot.slane %v628_v1, 5  ;;  %4009 = vmatprep.subr.bf16.mxu0 %v4363_v9  ;;  %v471_v29 = vshrl.u32 %v359_v26, 16  ;;  %v362_v1 = vld [vmem:[%s4579_s30 + $0x3c] sm:$0xf] }
  0x37   : > { %v705_v14 = vsel %vm4601_vm4, %v703_v7, %v704_v62  ;;  %v474_v30 = vshll.u32 %v359_v26, 16  ;;  %v484_v32 = vshrl.u32 %v360_v27, 16  ;;  %v490_v33 = vshll.u32 %v361_v28, 16 }
  0x38   : > { %3930 = vmatpush3.bf16.msra.mxu1 %v4353_v57  ;;  %1017 = vmatprep.mubr.bf16.mxu0 %v3380_v35  ;;  %v462_v57 = vrot.slane %v460_v49, 4  ;;  %v459_v13 = vsel %vm4607_vm5, %v454_v5, %v458_v56  ;;  %v709_v15 = vsel %vm4601_vm4, %v3393_v3, %v708_v8  ;;  %v710_v16 = vrot.slane %v708_v8, 4  ;;  %v3451_v35 = vld [vmem:[%s4579_s30 + $0x10] sm:$0xf]  ;;  %v364_v5 = vld [vmem:[%s4579_s30 + $0x44] sm:$0x1] }
  0x39   : > { %3931 = vmatprep.subr.bf16.mxu1 %v4355_v22  ;;  %v3400_v19 = vcombine.low %v702_v6, %v705_v14  ;;  %v4365_v22 = vld [vmem:[%s5284_s1 + $0x198] sm:$0xff]   ;;  %v473_v36 = vrot.slane %v471_v29, 4  ;;  %v476_v37 = vrot.slane %v474_v30, 5  ;;  %v492_v43 = vrot.slane %v490_v33, 5  ;;  %v4374_v33 = vld [vmem:[%s5284_s1 + $0x1e8] sm:$0xff]  }
  0x3a   : > { %v463_v0 = vor.u32 %v462_v57, %v458_v56  ;;  %v712_v21 = vsel %vm4601_vm4, %v710_v16, %v711_v12  ;;  %4010 = vmatpush3.bf16.msra.mxu0 %v4365_v22  ;;  %v1277_v44 = vshrl.u32 %v3450_v34, 16  ;;  %v1280_v45 = vshll.u32 %v3450_v34, 16  ;;  %v4368_v57 = vld [vmem:[%s4579_s30 + $0x30] sm:$0xff]   ;;  %v3455_v16 = vld [vmem:[%s4579_s30 + $0x20] sm:$0x1] }
  0x3b   : > { %1018 = vmatmul.mubr.bf16.gmra.mrb[8].mxu0 %v4354_v25  ;;  %4108 = vmatmul.mubr.bf16.gmra.mrb[8].mxu1 %v3399_v38  ;;  %v3401_v23 = vcombine.low %v709_v15, %v712_v21  ;;  %v4367_v25 = vld [vmem:[%s5284_s1 + $0xf8] sm:$0xff]   ;;  %v1286_v46 = vshll.u32 %v3451_v35, 16  ;;  %v477_v47 = vor.u32 %v476_v37, %v473_v36  ;;  %v1290_v49 = vshrl.u32 %v3451_v35, 16 }
  0x3c   : > { %3932 = vmatpush3.bf16.msra.mxu1 %v4357_v31  ;;  %v464_v10 = vrot.slane %v463_v0, 4  ;;  %4111 = vmatprep.mubr.bf16.mxu1 %v3400_v19  ;;  %v480_v31 = vshll.u32 %v360_v27, 16  ;;  %v1279_v51 = vrot.slane %v1277_v44, 4  ;;  %v1282_v52 = vrot.slane %v1280_v45, 5  ;;  %v4371_v0 = vld [vmem:[%s5284_s1 + $0x1a0] sm:$0xff]  }
  0x3d   : > { %3933 = vmatprep.subr.bf16.mxu1 %v4359_v39  ;;  %v486_v39 = vrot.slane %v484_v32, 4  ;;  %v1288_v53 = vrot.slane %v1286_v46, 5  ;;  %v478_v54 = vrot.slane %v477_v47, 4  ;;  %v1292_v56 = vrot.slane %v1290_v49, 4  ;;  %4011 = vmatprep.subr.bf16.mxu0 %v4370_v59  ;;  %v3454_v15 = vld [vmem:[%s4579_s30 + $0x1c] sm:$0xf] }
  0x3e   : > { %v469_v18 = vsel %vm4607_vm5, %v464_v10, %v468_v58  ;;  %v482_v38 = vrot.slane %v480_v31, 5  ;;  %v1283_v58 = vor.u32 %v1282_v52, %v1279_v51  ;;  %v495_v6 = vshrl.u32 %v362_v1, 16  ;;  %4012 = vmatpush3.bf16.msra.mxu0 %v4371_v0  ;;  %v365_v47 = vld [vmem:[%s4579_s30 + $0x48] sm:$0xf]  ;;  %v367_v49 = vld [vmem:[%s4579_s30 + $0x50] sm:$0x1] }
  0x3f   : > { %v3381_v20 = vcombine.low %v459_v13, %v469_v18  ;;  %v1293_v62 = vor.u32 %v1292_v56, %v1288_v53  ;;  %v498_v8 = vshll.u32 %v362_v1, 16  ;;  %v514_v14 = vshll.u32 %v364_v5, 16  ;;  %v4369_v18 = vld [vmem:[%s4579_s30 + $0xc] sm:$0xff]   ;;  %4013 = vmatprep.subr.bf16.mxu0 %v4374_v33  ;;  %v3457_v59 = vld [vmem:[%s4579_s30 + $0x28] sm:$0xf] }
  0x40   : > { %3934 = vmatpush3.bf16.msra.mxu1 %v4360_v41  ;;  %v3452_v41 = vld [vmem:[%s4579_s30 + $0x14] sm:$0x1]  ;;  %v487_v48 = vor.u32 %v486_v39, %v482_v38  ;;  %v483_v60 = vsel %vm4607_vm5, %v478_v54, %v482_v38  ;;  %v1284_v3 = vrot.slane %v1283_v58, 4  ;;  %v497_v13 = vrot.slane %v495_v6, 4  ;;  %v4372_v38 = vld [vmem:[%s4579_s30 + $0x3c] sm:$0xff]  }
  0x41   : > { %3935 = vmatprep.subr.bf16.mxu1 %v4362_v4  ;;  %1025 = vmatprep.mubr.bf16.mxu0 %v3381_v20  ;;  %v1296_v50 = vshll.u32 %v3452_v41, 16  ;;  %v363_v4 = vld [vmem:[%s4579_s30 + $0x40] sm:$0xf]  ;;  %v1294_v7 = vrot.slane %v1293_v62, 4  ;;  %v500_v19 = vrot.slane %v498_v8, 5  ;;  %v1310_v28 = vshll.u32 %v3454_v15, 16 }
  0x42   : > { %v488_v55 = vrot.slane %v487_v48, 4  ;;  %v504_v9 = vshll.u32 %v363_v4, 16  ;;  %v508_v10 = vshrl.u32 %v363_v4, 16  ;;  %v1289_v12 = vsel %vm4607_vm5, %v1284_v3, %v1288_v53  ;;  %v366_v48 = vld [vmem:[%s4579_s30 + $0x4c] sm:$0xf]  ;;  %v4378_v6 = vld [vmem:[%s5284_s1 + $0x140] sm:$0xff]  }
  0x43   : > { %1026 = vmatmul.mubr.bf16.gmra.mrb[12].mxu0 %v4361_v11  ;;  %4112 = vmatmul.mubr.bf16.gmra.mrb[12].mxu1 %v3401_v23  ;;  %v1298_v63 = vrot.slane %v1296_v50, 5  ;;  %v3453_v11 = vld [vmem:[%s4579_s30 + $0x18] sm:$0xf]  ;;  %v516_v23 = vrot.slane %v514_v14, 5  ;;  %v501_v26 = vor.u32 %v500_v19, %v497_v13  ;;  %v1314_v29 = vshrl.u32 %v3454_v15, 16  ;;  %v4379_v15 = vld [vmem:[%s5284_s1 + $0x1f0] sm:$0xff]  }
  0x44   : > { %3936 = vmatpush3.bf16.msra.mxu1 %v4364_v17  ;;  %v493_v61 = vsel %vm4607_vm5, %v488_v55, %v492_v43  ;;  %v506_v20 = vrot.slane %v504_v9, 5  ;;  %v510_v21 = vrot.slane %v508_v10, 4  ;;  %v1320_v32 = vshll.u32 %v3455_v16, 16  ;;  %v4375_v43 = vld [vmem:[%s5284_s1 + $0x1a8] sm:$0xff]   ;;  %v3456_v54 = vld [vmem:[%s4579_s30 + $0x24] sm:$0xf] }
  0x45   : > { %3937 = vmatprep.subr.bf16.mxu1 %v4366_v24  ;;  %v3382_v2 = vcombine.low %v483_v60, %v493_v61  ;;  %v1299_v17 = vsel %vm4607_vm5, %v1294_v7, %v1298_v63  ;;  %v1301_v24 = vshrl.u32 %v3453_v11, 16  ;;  %v502_v34 = vrot.slane %v501_v26, 4  ;;  %4014 = vmatpush3.bf16.msra.mxu0 %v4375_v43  ;;  %v4373_v61 = vld [vmem:[%s4579_s30 + $0x18] sm:$0xff]   ;;  %v3458_v0 = vld [vmem:[%s4579_s30 + $0x2c] sm:$0x1] }
  0x46   : > { %v3474_v22 = vcombine.low %v1289_v12, %v1299_v17  ;;  %v511_v27 = vor.u32 %v510_v21, %v506_v20  ;;  %v1312_v36 = vrot.slane %v1310_v28, 5  ;;  %v1316_v37 = vrot.slane %v1314_v29, 4  ;;  %v4376_v21 = vld [vmem:[%s4579_s30 + $0x48] sm:$0xff]   ;;  %4015 = vmatprep.subr.bf16.mxu0 %v4379_v15  ;;  %v368_v28 = vld [vmem:[%s4579_s30 + $0x54] sm:$0xf] }
  0x47   : > { %1033 = vmatprep.mubr.bf16.mxu0 %v3382_v2  ;;  %v1303_v30 = vrot.slane %v1301_v24, 4  ;;  %v1322_v41 = vrot.slane %v1320_v32, 5  ;;  %v507_v44 = vsel %vm4607_vm5, %v502_v34, %v506_v20  ;;  %v519_v52 = vshrl.u32 %v365_v47, 16  ;;  %v369_v29 = vld [vmem:[%s4579_s30 + $0x58] sm:$0xf] }
  0x48   : > { %3938 = vmatpush3.bf16.msra.mxu1 %v4367_v25  ;;  %v1304_v25 = vshll.u32 %v3453_v11, 16  ;;  %1901 = vmatprep.mubr.bf16.mxu1 %v3474_v22  ;;  %v512_v35 = vrot.slane %v511_v27, 4  ;;  %v1317_v46 = vor.u32 %v1316_v37, %v1312_v36  ;;  %v522_v53 = vshll.u32 %v365_v47, 16  ;;  %v4380_v27 = vld [vmem:[%s5284_s1 + $0x1b0] sm:$0xff]   ;;  %v370_v32 = vld [vmem:[%s4579_s30 + $0x5c] sm:$0x1] }
  0x49   : > { %v528_v56 = vshll.u32 %v366_v48, 16  ;;  %v538_v58 = vshll.u32 %v367_v49, 16  ;;  %v521_v62 = vrot.slane %v519_v52, 4  ;;  %v1325_v1 = vshrl.u32 %v3456_v54, 16  ;;  %4115 = vmatprep.subr.bf16.mxu1 %v4378_v6  ;;  %4016 = vmatpush3.bf16.msra.mxu0 %v4380_v27  ;;  %v3464_v15 = vld [vmem:[%s4579_s30 + $0x44] sm:$0x1] }
  0x4a   : > { %v1306_v31 = vrot.slane %v1304_v25, 5  ;;  %v517_v45 = vsel %vm4607_vm5, %v512_v35, %v516_v23  ;;  %v1318_v55 = vrot.slane %v1317_v46, 4  ;;  %v524_v63 = vrot.slane %v522_v53, 5  ;;  %v3461_v46 = vld [vmem:[%s4579_s30 + $0x38] sm:$0x1] }
  0x4b   : > { %1034 = vmatmul.mubr.bf16.gmra.mrb[16].mxu0 %v4368_v57  ;;  %1902 = vmatmul.mubr.bf16.vlgmr.msra.gmra.mrb[16].mxu1 %v4369_v18  ;;  %v3383_v50 = vcombine.low %v507_v44, %v517_v45  ;;  %v532_v57 = vshrl.u32 %v366_v48, 16  ;;  %v530_v3 = vrot.slane %v528_v56, 5  ;;  %v540_v5 = vrot.slane %v538_v58, 5  ;;  %v3460_v45 = vld [vmem:[%s4579_s30 + $0x34] sm:$0xf]  ;;  %v4377_v48 = vld [vmem:[%s4579_s30 + $0x24] sm:$0xff]  }
  0x4c   : > { %v1307_v39 = vor.u32 %v1306_v31, %v1303_v30  ;;  %v1323_v2 = vsel %vm4607_vm5, %v1318_v55, %v1322_v41  ;;  %v525_v8 = vor.u32 %v524_v63, %v521_v62  ;;  %v1327_v9 = vrot.slane %v1325_v1, 4  ;;  %4116 = vmatpush3.bf16.msra.mxu1 %v4378_v6 }
  0x4d   : > { %1041 = vmatprep.mubr.bf16.mxu0 %v3383_v50  ;;  %v534_v4 = vrot.slane %v532_v57, 4  ;;  %v1328_v10 = vshll.u32 %v3456_v54, 16  ;;  %v1334_v12 = vshll.u32 %v3457_v59, 16  ;;  %v1338_v13 = vshrl.u32 %v3457_v59, 16 }
  0x4e   : > { %v1308_v51 = vrot.slane %v1307_v39, 4  ;;  %v1344_v14 = vshll.u32 %v3458_v0, 16  ;;  %v526_v16 = vrot.slane %v525_v8, 4  ;;  %v543_v33 = vshrl.u32 %v368_v28, 16  ;;  %v3459_v39 = vld [vmem:[%s4579_s30 + $0x30] sm:$0xf] }
  0x4f   : > { %v535_v11 = vor.u32 %v534_v4, %v530_v3  ;;  %v1330_v17 = vrot.slane %v1328_v10, 5  ;;  %v1336_v19 = vrot.slane %v1334_v12, 5  ;;  %v1340_v20 = vrot.slane %v1338_v13, 4  ;;  %v4384_v0 = vld [vmem:[%s5284_s1 + $0x1f8] sm:$0xff]  }
  0x50   : > { %v1313_v60 = vsel %vm4607_vm5, %v1308_v51, %v1312_v36  ;;  %v531_v22 = vsel %vm4607_vm5, %v526_v16, %v530_v3  ;;  %v1346_v26 = vrot.slane %v1344_v14, 5  ;;  %v546_v34 = vshll.u32 %v368_v28, 16  ;;  %v4381_v4 = vld [vmem:[%s4579_s30 + $0x54] sm:$0xff]   ;;  %4017 = vmatprep.subr.bf16.mxu0 %v4384_v0  ;;  %v3463_v14 = vld [vmem:[%s4579_s30 + $0x40] sm:$0xf] }
  0x51   : > { %v3475_v7 = vcombine.low %v1313_v60, %v1323_v2  ;;  %v536_v18 = vrot.slane %v535_v11, 4  ;;  %v1331_v23 = vor.u32 %v1330_v17, %v1327_v9  ;;  %v1341_v25 = vor.u32 %v1340_v20, %v1336_v19  ;;  %v4383_v60 = vld [vmem:[%s5284_s1 + $0x148] sm:$0xff]   ;;  %v4385_v10 = vld [vmem:[%s5284_s1 + $0x1b8] sm:$0xff]   ;;  %v4382_v28 = vld [vmem:[%s4579_s30 + $0x30] sm:$0xff]  }
  0x52   : > { %v552_v36 = vshll.u32 %v369_v29, 16  ;;  %v556_v37 = vshrl.u32 %v369_v29, 16  ;;  %v545_v43 = vrot.slane %v543_v33, 4  ;;  %v548_v44 = vrot.slane %v546_v34, 5  ;;  %4117 = vmatprep.subr.bf16.mxu1 %v4383_v60  ;;  %v3462_v11 = vld [vmem:[%s4579_s30 + $0x3c] sm:$0xf]  ;;  %4018 = vmatpush3.bf16.msra.mxu0 %v4385_v10 }
  0x53   : > { %1042 = vmatmul.mubr.bf16.gmra.mrb[20].mxu0 %v4372_v38  ;;  %1909 = vmatprep.mubr.bf16.mxu1 %v3475_v7  ;;  %v541_v24 = vsel %vm4607_vm5, %v536_v18, %v540_v5  ;;  %v1332_v31 = vrot.slane %v1331_v23, 4  ;;  %v1342_v35 = vrot.slane %v1341_v25, 4  ;;  %v562_v38 = vshll.u32 %v370_v32, 16  ;;  %v3619_v25 = vld [vmem:[%s4579_s30 + $0x1c] sm:$0xf] }
  0x54   : > { %1910 = vmatmul.mubr.bf16.gmra.mrb[20].mxu1 %v4373_v61  ;;  %v3384_v30 = vcombine.low %v531_v22, %v541_v24  ;;  %v554_v49 = vrot.slane %v552_v36, 5  ;;  %v558_v50 = vrot.slane %v556_v37, 4  ;;  %v549_v53 = vor.u32 %v548_v44, %v545_v43  ;;  %v4387_v36 = vld [vmem:[%s5284_s1 + $0x150] sm:$0xff]   ;;  %v3621_v0 = vld [vmem:[%s4579_s30 + $0x24] sm:$0xf] }
  0x55   : > { %v1337_v41 = vsel %vm4607_vm5, %v1332_v31, %v1336_v19  ;;  %v1347_v47 = vsel %vm4607_vm5, %v1342_v35, %v1346_v26  ;;  %v564_v51 = vrot.slane %v562_v38, 5  ;;  %v1349_v54 = vshrl.u32 %v3459_v39, 16  ;;  %4118 = vmatpush3.bf16.msra.mxu1 %v4383_v60  ;;  %v3620_v26 = vld [vmem:[%s4579_s30 + $0x20] sm:$0x1] }
  0x56   : > { %1049 = vmatprep.mubr.bf16.mxu0 %v3384_v30  ;;  %v3476_v52 = vcombine.low %v1337_v41, %v1347_v47  ;;  %v1352_v55 = vshll.u32 %v3459_v39, 16  ;;  %v559_v56 = vor.u32 %v558_v50, %v554_v49  ;;  %v1358_v57 = vshll.u32 %v3460_v45, 16  ;;  %4119 = vmatprep.subr.bf16.mxu1 %v4387_v36 }
  0x57   : > { %v1362_v58 = vshrl.u32 %v3460_v45, 16  ;;  %v1368_v59 = vshll.u32 %v3461_v46, 16  ;;  %v550_v61 = vrot.slane %v549_v53, 4  ;;  %v1351_v62 = vrot.slane %v1349_v54, 4 }
  0x58   : > { %1917 = vmatprep.mubr.bf16.mxu1 %v3476_v52  ;;  %v1354_v63 = vrot.slane %v1352_v55, 5  ;;  %v560_v1 = vrot.slane %v559_v56, 4  ;;  %v1360_v2 = vrot.slane %v1358_v57, 5  ;;  %v1373_v16 = vshrl.u32 %v3462_v11, 16  ;;  %v4871_v52 = vld [vmem:[%s5284_s1 + $0x200] sm:$0xff]  }
  0x59   : > { %v1364_v3 = vrot.slane %v1362_v58, 4  ;;  %v555_v5 = vsel %vm4607_vm5, %v550_v61, %v554_v49  ;;  %v1370_v9 = vrot.slane %v1368_v59, 5  ;;  %v1376_v18 = vshll.u32 %v3462_v11, 16  ;;  %4120 = vmatpush3.bf16.msra.mxu1 %v4387_v36  ;;  %v3465_v56 = vld [vmem:[%s4579_s30 + $0x48] sm:$0xf]  ;;  %v4386_v61 = vld [vmem:[%s4579_s30 + $0x3c] sm:$0xff]   ;;  %4147 = vmatprep.subr.bf16.mxu0 %v4871_v52 }
  0x5a   : > { %v1355_v6 = vor.u32 %v1354_v63, %v1351_v62  ;;  %v565_v7 = vsel %vm4607_vm5, %v560_v1, %v564_v51  ;;  %v1382_v19 = vshll.u32 %v3463_v14, 16  ;;  %v1386_v20 = vshrl.u32 %v3463_v14, 16  ;;  %v3466_v57 = vld [vmem:[%s4579_s30 + $0x4c] sm:$0xf]  ;;  %v3467_v58 = vld [vmem:[%s4579_s30 + $0x50] sm:$0x1] }
  0x5b   : > { %1050 = vmatmul.mubr.bf16.gmra.mrb[24].mxu0 %v4376_v21  ;;  %v1365_v8 = vor.u32 %v1364_v3, %v1360_v2  ;;  %v3385_v12 = vcombine.low %v555_v5, %v565_v7  ;;  %v3618_v21 = vld [vmem:[%s4579_s30 + $0x18] sm:$0xf]  ;;  %v1375_v23 = vrot.slane %v1373_v16, 4  ;;  %v1392_v24 = vshll.u32 %v3464_v15, 16  ;;  %v3622_v5 = vld [vmem:[%s4579_s30 + $0x28] sm:$0xf] }
  0x5c   : > { %1918 = vmatmul.mubr.bf16.gmra.mrb[24].mxu1 %v4377_v48  ;;  %v1356_v13 = vrot.slane %v1355_v6, 4  ;;  %v1378_v29 = vrot.slane %v1376_v18, 5  ;;  %v1384_v30 = vrot.slane %v1382_v19, 5  ;;  %v1388_v31 = vrot.slane %v1386_v20, 4  ;;  %v4391_v11 = vld [vmem:[%s5284_s1 + $0x158] sm:$0xff]  }
  0x5d   : > { %v1366_v17 = vrot.slane %v1365_v8, 4  ;;  %1057 = vmatprep.mubr.bf16.mxu0 %v3385_v12  ;;  %v1394_v33 = vrot.slane %v1392_v24, 5  ;;  %v2209_v34 = vshrl.u32 %v3618_v21, 16  ;;  %v2212_v35 = vshll.u32 %v3618_v21, 16  ;;  %4121 = vmatprep.subr.bf16.mxu1 %v4391_v11  ;;  %v3469_v36 = vld [vmem:[%s4579_s30 + $0x58] sm:$0xf] }
  0x5e   : > { %v1361_v22 = vsel %vm4607_vm5, %v1356_v13, %v1360_v2  ;;  %v1379_v37 = vor.u32 %v1378_v29, %v1375_v23  ;;  %v1389_v38 = vor.u32 %v1388_v31, %v1384_v30  ;;  %v2218_v39 = vshll.u32 %v3619_v25, 16  ;;  %v4388_v13 = vld [vmem:[%s4579_s30 + $0x18] sm:$0xff]   ;;  %4122 = vmatpush3.bf16.msra.mxu1 %v4391_v11 }
  0x5f   : > { %v1371_v27 = vsel %vm4607_vm5, %v1366_v17, %v1370_v9  ;;  %v2222_v41 = vshrl.u32 %v3619_v25, 16  ;;  %v2211_v43 = vrot.slane %v2209_v34, 4  ;;  %v2214_v44 = vrot.slane %v2212_v35, 5  ;;  %v3623_v9 = vld [vmem:[%s4579_s30 + $0x2c] sm:$0x1] }
  0x60   : > { %v3477_v32 = vcombine.low %v1361_v22, %v1371_v27  ;;  %v2228_v45 = vshll.u32 %v3620_v26, 16  ;;  %v1380_v46 = vrot.slane %v1379_v37, 4  ;;  %v1390_v47 = vrot.slane %v1389_v38, 4  ;;  %v4896_v25 = vld [vmem:[%s5284_s1 + $0x208] sm:$0xff]   ;;  %v3468_v35 = vld [vmem:[%s4579_s30 + $0x54] sm:$0xf] }
  0x61   : > { %v2220_v48 = vrot.slane %v2218_v39, 5  ;;  %v2224_v49 = vrot.slane %v2222_v41, 4  ;;  %v2215_v50 = vor.u32 %v2214_v44, %v2211_v43  ;;  %v1397_v62 = vshrl.u32 %v3465_v56, 16  ;;  %v3470_v39 = vld [vmem:[%s4579_s30 + $0x5c] sm:$0x1] }
  0x62   : > { %1925 = vmatprep.mubr.bf16.mxu1 %v3477_v32  ;;  %v2230_v51 = vrot.slane %v2228_v45, 5  ;;  %v1385_v53 = vsel %vm4607_vm5, %v1380_v46, %v1384_v30  ;;  %v1395_v54 = vsel %vm4607_vm5, %v1390_v47, %v1394_v33  ;;  %v1400_v63 = vshll.u32 %v3465_v56, 16  ;;  %v4390_v32 = vld [vmem:[%s4579_s30 + $0x48] sm:$0xff]   ;;  %v3624_v44 = vld [vmem:[%s4579_s30 + $0x30] sm:$0xf] }
  0x63   : > { %1058 = vmatmul.mubr.bf16.gmra.mrb[28].mxu0 %v4381_v4  ;;  %v2225_v55 = vor.u32 %v2224_v49, %v2220_v48  ;;  %v3478_v59 = vcombine.low %v1385_v53, %v1395_v54  ;;  %v2216_v60 = vrot.slane %v2215_v50, 4  ;;  %v1406_v2 = vshll.u32 %v3466_v57, 16  ;;  %v3625_v49 = vld [vmem:[%s4579_s30 + $0x34] sm:$0xf]  ;;  %v3626_v56 = vld [vmem:[%s4579_s30 + $0x38] sm:$0x1] }
  0x64   : > { %1926 = vmatmul.mubr.bf16.gmra.mrb[28].mxu1 %v4382_v28  ;;  %v1410_v3 = vshrl.u32 %v3466_v57, 16  ;;  %v1416_v4 = vshll.u32 %v3467_v58, 16  ;;  %v1399_v7 = vrot.slane %v1397_v62, 4  ;;  %v1402_v8 = vrot.slane %v1400_v63, 5 }
  0x65   : > { %v2226_v1 = vrot.slane %v2225_v55, 4  ;;  %1933 = vmatprep.mubr.bf16.mxu1 %v3478_v59  ;;  %v2221_v6 = vsel %vm4607_vm5, %v2216_v60, %v2220_v48  ;;  %v2233_v10 = vshrl.u32 %v3621_v0, 16  ;;  %v1408_v14 = vrot.slane %v1406_v2, 5 }
  0x66   : > { %v1412_v15 = vrot.slane %v1410_v3, 4  ;;  %v1418_v16 = vrot.slane %v1416_v4, 5  ;;  %v1403_v18 = vor.u32 %v1402_v8, %v1399_v7  ;;  %v2236_v20 = vshll.u32 %v3621_v0, 16 }
  0x67   : > { %v2231_v12 = vsel %vm4607_vm5, %v2226_v1, %v2230_v51  ;;  %v2235_v19 = vrot.slane %v2233_v10, 4  ;;  %v2242_v22 = vshll.u32 %v3622_v5, 16  ;;  %v2246_v23 = vshrl.u32 %v3622_v5, 16  ;;  %v4392_v51 = vld [vmem:[%s4579_s30 + $0x24] sm:$0xff]  }
  0x68   : > { %v3642_v17 = vcombine.low %v2221_v6, %v2231_v12  ;;  %v1413_v21 = vor.u32 %v1412_v15, %v1408_v14  ;;  %v2252_v24 = vshll.u32 %v3623_v9, 16  ;;  %v1404_v26 = vrot.slane %v1403_v18, 4  ;;  %v4923_v12 = vld [vmem:[%s5284_s1 + $0x210] sm:$0xff]  }
  0x69   : > { %v2238_v27 = vrot.slane %v2236_v20, 5  ;;  %v2244_v29 = vrot.slane %v2242_v22, 5  ;;  %v2248_v30 = vrot.slane %v2246_v23, 4  ;;  %v1421_v41 = vshrl.u32 %v3468_v35, 16  ;;  %v3471_v20 = vld [vmem:[%s4579_s30 + $0x60] sm:$0xf] }
  0x6a   : > { %2833 = vmatprep.mubr.bf16.mxu0 %v3642_v17  ;;  %v1414_v28 = vrot.slane %v1413_v21, 4  ;;  %v2254_v31 = vrot.slane %v2252_v24, 5  ;;  %v1409_v33 = vsel %vm4607_vm5, %v1404_v26, %v1408_v14  ;;  %v1424_v43 = vshll.u32 %v3468_v35, 16  ;;  %v3472_v24 = vld [vmem:[%s4579_s30 + $0x64] sm:$0xf] }
  0x6b   : > { %2834 = vmatmul.mubr.bf16.vlgmr.msra.gmra.mrb[32].mxu0 %v4388_v13  ;;  %v2239_v34 = vor.u32 %v2238_v27, %v2235_v19  ;;  %v2249_v38 = vor.u32 %v2248_v30, %v2244_v29  ;;  %v1430_v47 = vshll.u32 %v3469_v36, 16  ;;  %v1434_v48 = vshrl.u32 %v3469_v36, 16  ;;  %v4398_v19 = vld [vmem:[%s5284_s1 + $0x168] sm:$0xff]   ;;  %v3628_v36 = vld [vmem:[%s4579_s30 + $0x40] sm:$0xf] }
  0x6c   : > { %1934 = vmatmul.mubr.bf16.gmra.mrb[32].mxu1 %v4386_v61  ;;  %4148 = vmatpush3.bf16.msra.mxu0 %v4871_v52  ;;  %v1419_v37 = vsel %vm4607_vm5, %v1414_v28, %v1418_v16  ;;  %v1423_v53 = vrot.slane %v1421_v41, 4  ;;  %v1426_v54 = vrot.slane %v1424_v43, 5  ;;  %v1440_v55 = vshll.u32 %v3470_v39, 16  ;;  %v4395_v61 = vld [vmem:[%s5284_s1 + $0x160] sm:$0xff]   ;;  %v4394_v16 = vld [vmem:[%s4579_s30 + $0x54] sm:$0xff]  }
  0x6d   : > { %4149 = vmatprep.subr.bf16.mxu0 %v4896_v25  ;;  %v3479_v45 = vcombine.low %v1409_v33, %v1419_v37  ;;  %v2240_v46 = vrot.slane %v2239_v34, 4  ;;  %v2250_v50 = vrot.slane %v2249_v38, 4  ;;  %v1432_v58 = vrot.slane %v1430_v47, 5  ;;  %4123 = vmatprep.subr.bf16.mxu1 %v4395_v61  ;;  %v3473_v26 = vld [vmem:[%s4579_s30 + $0x68] sm:$0x1] }
  0x6e   : > { %v1436_v59 = vrot.slane %v1434_v48, 4  ;;  %v2257_v60 = vshrl.u32 %v3624_v44, 16  ;;  %v1427_v63 = vor.u32 %v1426_v54, %v1423_v53  ;;  %v1442_v0 = vrot.slane %v1440_v55, 5  ;;  %4124 = vmatpush3.bf16.msra.mxu1 %v4395_v61  ;;  %v3629_v37 = vld [vmem:[%s4579_s30 + $0x44] sm:$0x1]  ;;  %v4400_v54 = vld [vmem:[%s5284_s1 + $0x170] sm:$0xff]  }
  0x6f   : > { %1941 = vmatprep.mubr.bf16.mxu1 %v3479_v45  ;;  %v2245_v57 = vsel %vm4607_vm5, %v2240_v46, %v2244_v29  ;;  %v2255_v62 = vsel %vm4607_vm5, %v2250_v50, %v2254_v31  ;;  %v2260_v1 = vshll.u32 %v3624_v44, 16  ;;  %v2266_v5 = vshll.u32 %v3625_v49, 16  ;;  %4125 = vmatprep.subr.bf16.mxu1 %v4398_v19  ;;  %v4396_v45 = vld [vmem:[%s4579_s30 + $0x30] sm:$0xff]  }
  0x70   : > { %4150 = vmatpush3.bf16.msra.mxu0 %v4896_v25  ;;  %v3643_v2 = vcombine.low %v2245_v57, %v2255_v62  ;;  %v1437_v3 = vor.u32 %v1436_v59, %v1432_v58  ;;  %v2259_v4 = vrot.slane %v2257_v60, 4  ;;  %v1428_v6 = vrot.slane %v1427_v63, 4  ;;  %v4399_v62 = vld [vmem:[%s4579_s30 + $0x60] sm:$0xff]  }
  0x71   : > { %v2262_v7 = vrot.slane %v2260_v1, 5  ;;  %v2270_v8 = vshrl.u32 %v3625_v49, 16  ;;  %v2276_v9 = vshll.u32 %v3626_v56, 16  ;;  %v2268_v11 = vrot.slane %v2266_v5, 5  ;;  %4151 = vmatprep.subr.bf16.mxu0 %v4923_v12  ;;  %v4403_v5 = vld [vmem:[%s5284_s1 + $0x178] sm:$0xff]  }
  0x72   : > { %2841 = vmatprep.mubr.bf16.mxu0 %v3643_v2  ;;  %v1438_v10 = vrot.slane %v1437_v3, 4  ;;  %v1433_v13 = vsel %vm4607_vm5, %v1428_v6, %v1432_v58  ;;  %v1445_v27 = vshrl.u32 %v3471_v20, 16  ;;  %v1448_v28 = vshll.u32 %v3471_v20, 16  ;;  %4126 = vmatpush3.bf16.msra.mxu1 %v4398_v19  ;;  %v3630_v19 = vld [vmem:[%s4579_s30 + $0x48] sm:$0xf] }
  0x73   : > { %2842 = vmatmul.mubr.bf16.gmra.mrb[36].mxu0 %v4392_v51  ;;  %v2263_v14 = vor.u32 %v2262_v7, %v2259_v4  ;;  %v2272_v15 = vrot.slane %v2270_v8, 4  ;;  %v2278_v18 = vrot.slane %v2276_v9, 5  ;;  %v1454_v29 = vshll.u32 %v3472_v24, 16  ;;  %4127 = vmatprep.subr.bf16.mxu1 %v4400_v54  ;;  %v3482_v8 = vld [vmem:[%s4579_s30 + $0xc] sm:$0xe] }
  0x74   : > { %1942 = vmatmul.mubr.bf16.gmra.mrb[36].mxu1 %v4390_v32  ;;  %v1443_v17 = vsel %vm4607_vm5, %v1438_v10, %v1442_v0  ;;  %4152 = vmatpush3.bf16.msra.mxu0 %v4923_v12  ;;  %v1458_v30 = vshrl.u32 %v3472_v24, 16  ;;  %v1464_v31 = vshll.u32 %v3473_v26, 16  ;;  %v3627_v32 = vld [vmem:[%s4579_s30 + $0x3c] sm:$0xf]  ;;  %v1447_v35 = vrot.slane %v1445_v27, 4 }
  0x75   : > { %v3480_v21 = vcombine.low %v1433_v13, %v1443_v17  ;;  %v2264_v22 = vrot.slane %v2263_v14, 4  ;;  %v2273_v23 = vor.u32 %v2272_v15, %v2268_v11  ;;  %v1450_v38 = vrot.slane %v1448_v28, 5  ;;  %v4953_v0 = vld [vmem:[%s5284_s1 + $0x218] sm:$0xff]   ;;  %v3483_v9 = vld [vmem:[%s4579_s30 + $0x10] sm:$0xf]  ;;  %v4970_v15 = vld [vmem:[%s5284_s1 + $0x220] sm:$0xff]  }
  0x76   : > { %v1456_v39 = vrot.slane %v1454_v29, 5  ;;  %v1460_v41 = vrot.slane %v1458_v30, 4  ;;  %v1466_v43 = vrot.slane %v1464_v31, 5  ;;  %v2281_v46 = vshrl.u32 %v3627_v32, 16  ;;  %4128 = vmatpush3.bf16.msra.mxu1 %v4400_v54  ;;  %4153 = vmatprep.subr.bf16.mxu0 %v4953_v0  ;;  %v4401_v17 = vld [vmem:[%s4579_s30 + $0x3c] sm:$0xff]  }
  0x77   : > { %1949 = vmatprep.mubr.bf16.mxu1 %v3480_v21  ;;  %v2269_v33 = vsel %vm4607_vm5, %v2264_v22, %v2268_v11  ;;  %v2274_v34 = vrot.slane %v2273_v23, 4  ;;  %v2284_v47 = vshll.u32 %v3627_v32, 16  ;;  %v2290_v48 = vshll.u32 %v3628_v36, 16  ;;  %4129 = vmatprep.subr.bf16.mxu1 %v4403_v5  ;;  %v3484_v11 = vld [vmem:[%s4579_s30 + $0x14] sm:$0x1] }
  0x78   : > { %v1451_v50 = vor.u32 %v1450_v38, %v1447_v35  ;;  %v1461_v51 = vor.u32 %v1460_v41, %v1456_v39  ;;  %v2294_v53 = vshrl.u32 %v3628_v36, 16  ;;  %v2283_v55 = vrot.slane %v2281_v46, 4  ;;  %4154 = vmatpush3.bf16.msra.mxu0 %v4953_v0  ;;  %v3631_v20 = vld [vmem:[%s4579_s30 + $0x4c] sm:$0xf]  ;;  %v3632_v24 = vld [vmem:[%s4579_s30 + $0x50] sm:$0x1] }
  0x79   : > { %v2279_v44 = vsel %vm4607_vm5, %v2274_v34, %v2278_v18  ;;  %v2286_v56 = vrot.slane %v2284_v47, 5  ;;  %v2292_v57 = vrot.slane %v2290_v48, 5  ;;  %v2300_v58 = vshll.u32 %v3629_v37, 16  ;;  %v3485_v27 = vld [vmem:[%s4579_s30 + $0x18] sm:$0xe]  ;;  %4155 = vmatprep.subr.bf16.mxu0 %v4970_v15 }
  0x7a   : > { %v3644_v49 = vcombine.low %v2269_v33, %v2279_v44  ;;  %v1452_v59 = vrot.slane %v1451_v50, 4  ;;  %v1462_v60 = vrot.slane %v1461_v51, 4  ;;  %v2296_v61 = vrot.slane %v2294_v53, 4  ;;  %4130 = vmatpush3.bf16.msra.mxu1 %v4403_v5  ;;  %v3486_v32 = vld [vmem:[%s4579_s30 + $0x1c] sm:$0xf]  ;;  %v4989_v33 = vld [vmem:[%s5284_s1 + $0x228] sm:$0xff]  }
  0x7b   : > { %v2287_v63 = vor.u32 %v2286_v56, %v2283_v55  ;;  %v2302_v4 = vrot.slane %v2300_v58, 5  ;;  %v3506_v13 = vrot.slane %v3482_v8, 9  ;;  %v1558_v14 = vrot.slane %v3483_v9, 5  ;;  %4179 = vmatprep.subr.bf16.mxu1 %v4871_v52  ;;  %v3487_v37 = vld [vmem:[%s4579_s30 + $0x20] sm:$0x1] }
  0x7c   : > { %1950 = vmatmul.mubr.bf16.gmra.mrb[40].mxu1 %v4394_v16  ;;  %2849 = vmatprep.mubr.bf16.mxu0 %v3644_v49  ;;  %v1457_v1 = vsel %vm4607_vm5, %v1452_v59, %v1456_v39  ;;  %v1467_v2 = vsel %vm4607_vm5, %v1462_v60, %v1466_v43  ;;  %v2297_v3 = vor.u32 %v2296_v61, %v2292_v57  ;;  %v1561_v18 = vrot.slane %v3484_v11, 5  ;;  %v3488_v51 = vld [vmem:[%s4579_s30 + $0x24] sm:$0xe]  ;;  %v3489_v55 = vld [vmem:[%s4579_s30 + $0x28] sm:$0xf] }
  0x7d   : > { %2850 = vmatmul.mubr.bf16.gmra.mrb[40].mxu0 %v4396_v45  ;;  %v3481_v6 = vcombine.low %v1457_v1, %v1467_v2  ;;  %v2288_v7 = vrot.slane %v2287_v63, 4  ;;  %v1559_v22 = vsel %vm4601_vm4, %v3506_v13, %v1558_v14  ;;  %v1560_v23 = vrot.slane %v1558_v14, 4  ;;  %v4999_v45 = vld [vmem:[%s5284_s1 + $0x230] sm:$0xff]   ;;  %v3490_v56 = vld [vmem:[%s4579_s30 + $0x2c] sm:$0x1] }
  0x7e   : > { %v2298_v10 = vrot.slane %v2297_v3, 4  ;;  %v2305_v26 = vshrl.u32 %v3630_v19, 16  ;;  %v2308_v29 = vshll.u32 %v3630_v19, 16  ;;  %v2314_v30 = vshll.u32 %v3631_v20, 16  ;;  %4156 = vmatpush3.bf16.msra.mxu0 %v4970_v15  ;;  %v4404_v60 = vld [vmem:[%s4579_s30 + $0x48] sm:$0xff]   ;;  %v5027_v19 = vld [vmem:[%s5284_s1 + $0x238] sm:$0xff]  }
  0x7f   : > { %1957 = vmatprep.mubr.bf16.mxu1 %v3481_v6  ;;  %v2293_v16 = vsel %vm4607_vm5, %v2288_v7, %v2292_v57  ;;  %v2318_v31 = vshrl.u32 %v3631_v20, 16  ;;  %v1562_v34 = vsel %vm4601_vm4, %v1560_v23, %v1561_v18  ;;  %v2324_v36 = vshll.u32 %v3632_v24, 16  ;;  %4157 = vmatprep.subr.bf16.mxu0 %v4989_v33  ;;  %v3633_v63 = vld [vmem:[%s4579_s30 + $0x54] sm:$0xf]  ;;  %v3634_v2 = vld [vmem:[%s4579_s30 + $0x58] sm:$0xf] }
  0x80   : > { %v2303_v21 = vsel %vm4607_vm5, %v2298_v10, %v2302_v4  ;;  %v2307_v35 = vrot.slane %v2305_v26, 4  ;;  %v3507_v38 = vrot.slane %v3485_v27, 9  ;;  %v3514_v39 = vcombine.low %v1559_v22, %v1562_v34  ;;  %v3635_v3 = vld [vmem:[%s4579_s30 + $0x5c] sm:$0x1]  ;;  %v3491_v10 = vld [vmem:[%s4579_s30 + $0x30] sm:$0xe] }
  0x81   : > { %v3645_v28 = vcombine.low %v2293_v16, %v2303_v21  ;;  %v2310_v41 = vrot.slane %v2308_v29, 5  ;;  %v2316_v43 = vrot.slane %v2314_v30, 5  ;;  %v2320_v44 = vrot.slane %v2318_v31, 4  ;;  %v3492_v11 = vld [vmem:[%s4579_s30 + $0x34] sm:$0xf] }
  0x82   : > { %v2326_v46 = vrot.slane %v2324_v36, 5  ;;  %v1565_v47 = vrot.slane %v3486_v32, 5  ;;  %v1568_v48 = vrot.slane %v3487_v37, 5  ;;  %v3508_v57 = vrot.slane %v3488_v51, 9  ;;  %4158 = vmatpush3.bf16.msra.mxu0 %v4989_v33  ;;  %v3493_v13 = vld [vmem:[%s4579_s30 + $0x38] sm:$0x1] }
  0x83   : > { %2857 = vmatprep.mubr.bf16.mxu0 %v3645_v28  ;;  %v2311_v49 = vor.u32 %v2310_v41, %v2307_v35  ;;  %v2321_v50 = vor.u32 %v2320_v44, %v2316_v43  ;;  %v1572_v61 = vrot.slane %v3489_v55, 5  ;;  %4159 = vmatprep.subr.bf16.mxu0 %v4999_v45  ;;  %v2329_v4 = vshrl.u32 %v3633_v63, 16  ;;  %v3494_v34 = vld [vmem:[%s4579_s30 + $0x3c] sm:$0xe]  ;;  %v3495_v37 = vld [vmem:[%s4579_s30 + $0x40] sm:$0xf] }
  0x84   : > { %1958 = vmatmul.mubr.bf16.gmra.mrb[44].mxu1 %v4399_v62  ;;  %v1566_v53 = vsel %vm4601_vm4, %v3507_v38, %v1565_v47  ;;  %v1567_v54 = vrot.slane %v1565_v47, 4  ;;  %v1575_v62 = vrot.slane %v3490_v56, 5  ;;  %v2332_v5 = vshll.u32 %v3633_v63, 16  ;;  %v3496_v38 = vld [vmem:[%s4579_s30 + $0x44] sm:$0x1]  ;;  %v4406_v56 = vld [vmem:[%s4579_s30 + $0x54] sm:$0xff]  }
  0x85   : > { %2858 = vmatmul.mubr.bf16.gmra.mrb[44].mxu0 %v4401_v17  ;;  %4131 = vmatprep.mubr.bf16.mxu1 %v3514_v39  ;;  %v2312_v58 = vrot.slane %v2311_v49, 4  ;;  %v2322_v59 = vrot.slane %v2321_v50, 4  ;;  %v1573_v9 = vsel %vm4601_vm4, %v3508_v57, %v1572_v61  ;;  %v1574_v16 = vrot.slane %v1572_v61, 4  ;;  %v3637_v49 = vld [vmem:[%s4579_s30 + $0x64] sm:$0xf] }
  0x86   : > { %v1569_v1 = vsel %vm4601_vm4, %v1567_v54, %v1568_v48  ;;  %v2331_v17 = vrot.slane %v2329_v4, 4  ;;  %v2334_v18 = vrot.slane %v2332_v5, 5  ;;  %4160 = vmatpush3.bf16.msra.mxu0 %v4999_v45  ;;  %v2338_v20 = vshll.u32 %v3634_v2, 16  ;;  %v3638_v50 = vld [vmem:[%s4579_s30 + $0x68] sm:$0x1] }
  0x87   : > { %v2317_v6 = vsel %vm4607_vm5, %v2312_v58, %v2316_v43  ;;  %v2327_v7 = vsel %vm4607_vm5, %v2322_v59, %v2326_v46  ;;  %v3515_v8 = vcombine.low %v1566_v53, %v1569_v1  ;;  %v2342_v21 = vshrl.u32 %v3634_v2, 16  ;;  %4161 = vmatprep.subr.bf16.mxu0 %v5027_v19  ;;  %v3636_v46 = vld [vmem:[%s4579_s30 + $0x60] sm:$0xf]  ;;  %v3497_v58 = vld [vmem:[%s4579_s30 + $0x48] sm:$0xe] }
  0x88   : > { %v3646_v14 = vcombine.low %v2317_v6, %v2327_v7  ;;  %v2348_v22 = vshll.u32 %v3635_v3, 16  ;;  %v3509_v23 = vrot.slane %v3491_v10, 9  ;;  %v1576_v24 = vsel %vm4601_vm4, %v1574_v16, %v1575_v62  ;;  %v3498_v59 = vld [vmem:[%s4579_s30 + $0x4c] sm:$0xf]  ;;  %v3499_v1 = vld [vmem:[%s4579_s30 + $0x50] sm:$0x1] }
  0x89   : > { %v2335_v26 = vor.u32 %v2334_v18, %v2331_v17  ;;  %v1579_v27 = vrot.slane %v3492_v11, 5  ;;  %v1582_v28 = vrot.slane %v3493_v13, 5  ;;  %v3516_v29 = vcombine.low %v1573_v9, %v1576_v24  ;;  %v3500_v16 = vld [vmem:[%s4579_s30 + $0x54] sm:$0xe]  ;;  %v3501_v18 = vld [vmem:[%s4579_s30 + $0x58] sm:$0xf] }
  0x8a   : > { %2865 = vmatprep.mubr.bf16.mxu0 %v3646_v14  ;;  %v2340_v30 = vrot.slane %v2338_v20, 5  ;;  %v2344_v31 = vrot.slane %v2342_v21, 4  ;;  %v2350_v32 = vrot.slane %v2348_v22, 5  ;;  %v3510_v41 = vrot.slane %v3494_v34, 9  ;;  %4162 = vmatpush3.bf16.msra.mxu0 %v5027_v19  ;;  %v3502_v20 = vld [vmem:[%s4579_s30 + $0x5c] sm:$0x1] }
  0x8b   : > { %v2336_v35 = vrot.slane %v2335_v26, 4  ;;  %v1581_v36 = vrot.slane %v1579_v27, 4  ;;  %v1586_v43 = vrot.slane %v3495_v37, 5  ;;  %v1589_v44 = vrot.slane %v3496_v38, 5  ;;  %v3639_v26 = vld [vmem:[%s4579_s30 + $0x6c] sm:$0xf] }
  0x8c   : > { %4132 = vmatmul.mubr.bf16.vlgmr.msra.gmra.mrb[0].mxu1 %v3515_v8  ;;  %v2345_v39 = vor.u32 %v2344_v31, %v2340_v30  ;;  %v2353_v51 = vshrl.u32 %v3636_v46, 16  ;;  %v2356_v53 = vshll.u32 %v3636_v46, 16  ;;  %v2362_v62 = vshll.u32 %v3637_v49, 16  ;;  %v3503_v37 = vld [vmem:[%s4579_s30 + $0x60] sm:$0xe] }
  0x8d   : > { %4187 = vmatpush3.bf16.msra.mxu1 %v4871_v52  ;;  %2866 = vmatmul.mubr.bf16.gmra.mrb[48].mxu0 %v4404_v60  ;;  %v1580_v52 = vsel %vm4601_vm4, %v3509_v23, %v1579_v27  ;;  %v2341_v47 = vsel %vm4607_vm5, %v2336_v35, %v2340_v30  ;;  %v1583_v48 = vsel %vm4601_vm4, %v1581_v36, %v1582_v28  ;;  %v2366_v63 = vshrl.u32 %v3637_v49, 16  ;;  %v3640_v27 = vld [vmem:[%s4579_s30 + $0x70] sm:$0xf]  ;;  %v3641_v30 = vld [vmem:[%s4579_s30 + $0x74] sm:$0x1] }
  0x8e   : > { %4180 = vmatprep.subr.bf16.mxu1 %v4896_v25  ;;  %4135 = vmatprep.mubr.bf16.mxu1 %v3516_v29  ;;  %v2346_v54 = vrot.slane %v2345_v39, 4  ;;  %v3517_v55 = vcombine.low %v1580_v52, %v1583_v48  ;;  %v1587_v57 = vsel %vm4601_vm4, %v3510_v41, %v1586_v43  ;;  %v2355_v60 = vrot.slane %v2353_v51, 4  ;;  %v4408_v39 = vld [vmem:[%s4579_s30 + $0x60] sm:$0xff]   ;;  %v3505_v46 = vld [vmem:[%s4579_s30 + $0x68] sm:$0x1] }
  0x8f   : > { %v2358_v61 = vrot.slane %v2356_v53, 5  ;;  %v2372_v4 = vshll.u32 %v3638_v50, 16  ;;  %v3511_v5 = vrot.slane %v3497_v58, 9  ;;  %v2364_v9 = vrot.slane %v2362_v62, 5  ;;  %v3651_v62 = vld [vmem:[%s4579_s30 + $0x1c] sm:$0xf] }
  0x90   : > { %v2351_v2 = vsel %vm4607_vm5, %v2346_v54, %v2350_v32  ;;  %v2368_v10 = vrot.slane %v2366_v63, 4  ;;  %v1593_v13 = vrot.slane %v3498_v59, 5  ;;  %v1596_v14 = vrot.slane %v3499_v1, 5  ;;  %v3650_v59 = vld [vmem:[%s4579_s30 + $0x18] sm:$0xe] }
  0x91   : > { %4188 = vmatpush3.bf16.msra.mxu1 %v4896_v25  ;;  %v1588_v25 = vrot.slane %v1586_v43, 4  ;;  %v3647_v6 = vcombine.low %v2341_v47, %v2351_v2  ;;  %v2359_v8 = vor.u32 %v2358_v61, %v2355_v60  ;;  %v2374_v11 = vrot.slane %v2372_v4, 5  ;;  %v3652_v63 = vld [vmem:[%s4579_s30 + $0x20] sm:$0x1]  ;;  %v3662_v4 = vld [vmem:[%s4579_s30 + $0x48] sm:$0xe] }
  0x92   : > { %4181 = vmatprep.subr.bf16.mxu1 %v4923_v12  ;;  %v3512_v21 = vrot.slane %v3500_v16, 9  ;;  %v1594_v22 = vsel %vm4601_vm4, %v3511_v5, %v1593_v13  ;;  %v1595_v23 = vrot.slane %v1593_v13, 4  ;;  %v1600_v24 = vrot.slane %v3501_v18, 5  ;;  %v3663_v5 = vld [vmem:[%s4579_s30 + $0x4c] sm:$0xf] }
  0x93   : > { %v1590_v3 = vsel %vm4601_vm4, %v1588_v25, %v1589_v44  ;;  %2873 = vmatprep.mubr.bf16.mxu0 %v3647_v6  ;;  %v2360_v17 = vrot.slane %v2359_v8, 4  ;;  %v1603_v29 = vrot.slane %v3502_v20, 5  ;;  %v2377_v31 = vshrl.u32 %v3639_v26, 16  ;;  %v3653_v18 = vld [vmem:[%s4579_s30 + $0x24] sm:$0xe] }
  0x94   : > { %4136 = vmatmul.mubr.bf16.gmra.mrb[4].mxu1 %v3517_v55  ;;  %v3518_v7 = vcombine.low %v1587_v57, %v1590_v3  ;;  %v2380_v32 = vshll.u32 %v3639_v26, 16  ;;  %v1597_v35 = vsel %vm4601_vm4, %v1595_v23, %v1596_v14  ;;  %v1601_v52 = vsel %vm4601_vm4, %v3512_v21, %v1600_v24  ;;  %v4410_v14 = vld [vmem:[%s4579_s30 + $0x6c] sm:$0xff]  }
  0x95   : > { %4189 = vmatpush3.bf16.msra.mxu1 %v4923_v12  ;;  %2874 = vmatmul.mubr.bf16.gmra.mrb[52].mxu0 %v4406_v56  ;;  %v2369_v12 = vor.u32 %v2368_v10, %v2364_v9  ;;  %v2365_v28 = vsel %vm4607_vm5, %v2360_v17, %v2364_v9  ;;  %v1602_v36 = vrot.slane %v1600_v24, 4  ;;  %v3519_v38 = vcombine.low %v1594_v22, %v1597_v35  ;;  %v3664_v9 = vld [vmem:[%s4579_s30 + $0x50] sm:$0x1]  ;;  %v3655_v22 = vld [vmem:[%s4579_s30 + $0x2c] sm:$0x1] }
  0x96   : > { %4182 = vmatprep.subr.bf16.mxu1 %v4953_v0  ;;  %4139 = vmatprep.mubr.bf16.mxu1 %v3518_v7  ;;  %v2379_v41 = vrot.slane %v2377_v31, 4  ;;  %v2382_v43 = vrot.slane %v2380_v32, 5  ;;  %v2386_v44 = vshll.u32 %v3640_v27, 16  ;;  %v2390_v49 = vshrl.u32 %v3640_v27, 16  ;;  %v3667_v35 = vld [vmem:[%s4579_s30 + $0x5c] sm:$0x1] }
  0x97   : > { %v2370_v34 = vrot.slane %v2369_v12, 4  ;;  %v1604_v48 = vsel %vm4601_vm4, %v1602_v36, %v1603_v29  ;;  %v2396_v50 = vshll.u32 %v3641_v30, 16  ;;  %v3513_v25 = vrot.slane %v3503_v37, 9  ;;  %v3665_v29 = vld [vmem:[%s4579_s30 + $0x54] sm:$0xe] }
  0x98   : > { %v3520_v53 = vcombine.low %v1601_v52, %v1604_v48  ;;  %v2383_v54 = vor.u32 %v2382_v43, %v2379_v41  ;;  %v2388_v55 = vrot.slane %v2386_v44, 5  ;;  %v2392_v56 = vrot.slane %v2390_v49, 4  ;;  %v3666_v30 = vld [vmem:[%s4579_s30 + $0x58] sm:$0xf] }
  0x99   : > { %4190 = vmatpush3.bf16.msra.mxu1 %v4953_v0  ;;  %v3504_v0 = vld [vmem:[%s4579_s30 + $0x64] sm:$0xf]  ;;  %v2375_v47 = vsel %vm4607_vm5, %v2370_v34, %v2374_v11  ;;  %v2398_v57 = vrot.slane %v2396_v50, 5  ;;  %v1610_v61 = vrot.slane %v3505_v46, 5  ;;  %v3674_v3 = vrot.slane %v3650_v59, 9 }
  0x9a   : > { %4183 = vmatprep.subr.bf16.mxu1 %v4970_v15  ;;  %v3648_v51 = vcombine.low %v2365_v28, %v2375_v47  ;;  %v1607_v58 = vrot.slane %v3504_v0, 5  ;;  %v2384_v60 = vrot.slane %v2383_v54, 4  ;;  %v2393_v1 = vor.u32 %v2392_v56, %v2388_v55  ;;  %v3668_v47 = vld [vmem:[%s4579_s30 + $0x60] sm:$0xe] }
  0x9b   : > { %v2490_v7 = vrot.slane %v3651_v62, 5  ;;  %v2493_v8 = vrot.slane %v3652_v63, 5  ;;  %v3678_v10 = vrot.slane %v3662_v4, 9  ;;  %v2518_v16 = vrot.slane %v3663_v5, 5  ;;  %v3661_v62 = vld [vmem:[%s4579_s30 + $0x44] sm:$0x1] }
  0x9c   : > { %4140 = vmatmul.mubr.bf16.gmra.mrb[8].mxu1 %v3519_v38  ;;  %2881 = vmatprep.mubr.bf16.mxu0 %v3648_v51  ;;  %v1609_v2 = vrot.slane %v1607_v58, 4  ;;  %v2389_v6 = vsel %vm4607_vm5, %v2384_v60, %v2388_v55  ;;  %v2394_v11 = vrot.slane %v2393_v1, 4  ;;  %v2521_v17 = vrot.slane %v3664_v9, 5  ;;  %v3657_v38 = vld [vmem:[%s4579_s30 + $0x34] sm:$0xf] }
  0x9d   : > { %4191 = vmatpush3.bf16.msra.mxu1 %v4970_v15  ;;  %2882 = vmatmul.mubr.bf16.gmra.mrb[56].mxu0 %v4408_v39  ;;  %v1608_v15 = vsel %vm4601_vm4, %v3513_v25, %v1607_v58  ;;  %v2491_v21 = vsel %vm4601_vm4, %v3674_v3, %v2490_v7  ;;  %v2492_v12 = vrot.slane %v2490_v7, 4  ;;  %v3675_v23 = vrot.slane %v3653_v18, 9  ;;  %v3658_v39 = vld [vmem:[%s4579_s30 + $0x38] sm:$0x1]  ;;  %v3669_v51 = vld [vmem:[%s4579_s30 + $0x64] sm:$0xf] }
  0x9e   : > { %4184 = vmatprep.subr.bf16.mxu1 %v4989_v33  ;;  %4143 = vmatprep.mubr.bf16.mxu1 %v3520_v53  ;;  %v1611_v13 = vsel %vm4601_vm4, %v1609_v2, %v1610_v61  ;;  %v2399_v24 = vsel %vm4607_vm5, %v2394_v11, %v2398_v57  ;;  %v2519_v26 = vsel %vm4601_vm4, %v3678_v10, %v2518_v16  ;;  %v2520_v27 = vrot.slane %v2518_v16, 4  ;;  %v3670_v53 = vld [vmem:[%s4579_s30 + $0x68] sm:$0x1]  ;;  %v3659_v57 = vld [vmem:[%s4579_s30 + $0x3c] sm:$0xe] }
  0x9f   : > { %v3521_v20 = vcombine.low %v1608_v15, %v1611_v13  ;;  %v3649_v31 = vcombine.low %v2389_v6, %v2399_v24  ;;  %v2494_v32 = vsel %vm4601_vm4, %v2492_v12, %v2493_v8  ;;  %v2500_v34 = vrot.slane %v3655_v22, 5  ;;  %v3660_v25 = vld [vmem:[%s4579_s30 + $0x40] sm:$0xf]  ;;  %v3671_v3 = vld [vmem:[%s4579_s30 + $0x6c] sm:$0xe] }
  0xa0   : > { %v3679_v52 = vrot.slane %v3665_v29, 9  ;;  %v3682_v36 = vcombine.low %v2491_v21, %v2494_v32  ;;  %v2522_v37 = vsel %vm4601_vm4, %v2520_v27, %v2521_v17  ;;  %v2525_v43 = vrot.slane %v3666_v30, 5  ;;  %v3672_v7 = vld [vmem:[%s4579_s30 + $0x70] sm:$0xf]  ;;  %v3673_v8 = vld [vmem:[%s4579_s30 + $0x74] sm:$0x1] }
  0xa1   : > { %4192 = vmatpush3.bf16.msra.mxu1 %v4989_v33  ;;  %v3654_v33 = vld [vmem:[%s4579_s30 + $0x28] sm:$0xf]  ;;  %2889 = vmatprep.mubr.bf16.mxu0 %v3649_v31  ;;  %v3686_v41 = vcombine.low %v2519_v26, %v2522_v37  ;;  %v2528_v44 = vrot.slane %v3667_v35, 5  ;;  %v3676_v46 = vrot.slane %v3656_v42, 9  ;;  %v2504_v49 = vrot.slane %v3657_v38, 5  ;;  %s3364_s30 = sshll.u32 %s4434_s15, 3 }
  0xa2   : > { %4185 = vmatprep.subr.bf16.mxu1 %v4999_v45  ;;  %v2497_v28 = vrot.slane %v3654_v33, 5  ;;  %v2507_v50 = vrot.slane %v3658_v39, 5  ;;  %v2526_v54 = vsel %vm4601_vm4, %v3679_v52, %v2525_v43  ;;  %v2527_v55 = vrot.slane %v2525_v43, 4  ;;  %p252_p7 = scmp.lt.s32.totalorder %s3364_s30, 15 }
  0xa3   : > { %v3680_v56 = vrot.slane %v3668_v47, 9  ;;  %v2505_v58 = vsel %vm4601_vm4, %v3676_v46, %v2504_v49  ;;  %v2506_v59 = vrot.slane %v2504_v49, 4  ;;  %v2532_v60 = vrot.slane %v3669_v51, 5 }
  0xa4   : > { %4144 = vmatmul.mubr.bf16.gmra.mrb[12].mxu1 %v3521_v20  ;;  %v2499_v0 = vrot.slane %v2497_v28, 4  ;;  %v2535_v61 = vrot.slane %v3670_v53, 5  ;;  %v2529_v1 = vsel %vm4601_vm4, %v2527_v55, %v2528_v44  ;;  %v3677_v15 = vrot.slane %v3659_v57, 9  ;;  %s5307_s30 = smov (!%p252_p7, %s3364_s30), 15 }
  0xa5   : > { %4193 = vmatpush3.bf16.msra.mxu1 %v4999_v45  ;;  %2890 = vmatmul.mubr.bf16.gmra.mrb[60].mxu0 %v4410_v14  ;;  %v2498_v45 = vsel %vm4601_vm4, %v3675_v23, %v2497_v28  ;;  %v2511_v2 = vrot.slane %v3660_v25, 5  ;;  %v3687_v4 = vcombine.low %v2526_v54, %v2529_v1  ;;  %v2508_v5 = vsel %vm4601_vm4, %v2506_v59, %v2507_v50  ;;  %s3365_s15 = sshll.u32 %s5307_s30, 1 }
  0xa6   : > { %4186 = vmatprep.subr.bf16.mxu1 %v5027_v19  ;;  %v2501_v48 = vsel %vm4601_vm4, %v2499_v0, %v2500_v34  ;;  %4163 = vmatprep.mubr.bf16.mxu0 %v3682_v36  ;;  %v2534_v6 = vrot.slane %v2532_v60, 4  ;;  %v3684_v9 = vcombine.low %v2505_v58, %v2508_v5  ;;  %v2514_v11 = vrot.slane %v3661_v62, 5  ;;  %s256_s8 = sadd.s32 %s3366_s7, %s3365_s15 }
  0xa7   : > { %4171 = vmatprep.mubr.bf16.mxu1 %v3686_v41  ;;  %v3683_v63 = vcombine.low %v2498_v45, %v2501_v48  ;;  %v2513_v10 = vrot.slane %v2511_v2, 4  ;;  %v3681_v13 = vrot.slane %v3671_v3, 9  ;;  %v2539_v16 = vrot.slane %v3672_v7, 5  ;;  %s3367_s9 = sshll.u32 %s256_s8, 2 }
  0xa8   : > { %v2536_v14 = vsel %vm4601_vm4, %v2534_v6, %v2535_v61  ;;  %v2542_v17 = vrot.slane %v3673_v8, 5  ;;  %v2512_v12 = vsel %vm4601_vm4, %v3677_v15, %v2511_v2  ;;  %s5231_s12 = scalar_lea.vmem %s5285_s2, %s3367_s9 }
  0xa9   : > { %4194 = vmatpush3.bf16.msra.mxu1 %v5027_v19  ;;  %v2533_v19 = vsel %vm4601_vm4, %v3680_v56, %v2532_v60  ;;  %v2540_v20 = vsel %vm4601_vm4, %v3681_v13, %v2539_v16  ;;  %v2541_v21 = vrot.slane %v2539_v16, 4  ;;  %v2515_v33 = vsel %vm4601_vm4, %v2513_v10, %v2514_v11 }
  0xaa   : > { %v3688_v18 = vcombine.low %v2533_v19, %v2536_v14  ;;  %v3685_v24 = vcombine.low %v2512_v12, %v2515_v33 }
  0xab   : > { %v2543_v22 = vsel %vm4601_vm4, %v2541_v21, %v2542_v17 }
  0xac   : > { %4172 = vmatmul.mubr.bf16.vlgmr.msra.gmra.mrb[8].mxu1 %v3687_v4  ;;  %v3689_v23 = vcombine.low %v2540_v20, %v2543_v22 }
  0xad   : > { %4164 = vmatmul.mubr.bf16.vlgmr.msra.gmra.mrb[64].mxu0 %v3683_v63  ;;  %4175 = vmatprep.mubr.bf16.mxu1 %v3688_v18 }
  0xae   : > { %4167 = vmatprep.mubr.bf16.mxu0 %v3684_v9 }
  0xb4   : > { %4176 = vmatmul.mubr.bf16.gmra.mrb[12].mxu1 %v3689_v23 }
  0xb5   : > { %4168 = vmatmul.mubr.bf16.gmra.mrb[68].mxu0 %v3685_v24 }
  0xfe   : > { %v3859_v26 = vpop.f32.mrb[0].mxu0 }
  0xff   : > { %v3860_v27 = vpop.f32.mrb[1].mxu0 }
 0x100   : > { %v3861_v28 = vadd.f32 %v3860_v27, %v3859_v26  ;;  %v3862_v29 = vpop.f32.mrb[2].mxu0 }
 0x101   : > { %v3863_v30 = vpop.f32.mrb[3].mxu0 }
 0x102   : > { %v3864_v31 = vadd.f32 %v3863_v30, %v3862_v29 }
 0x106   : > { %v3865_v32 = vpop.f32.mrb[4].mxu0 }
 0x107   : > { %v3866_v34 = vpop.f32.mrb[5].mxu0 }
 0x108   : > { %v3867_v35 = vadd.f32 %v3866_v34, %v3865_v32  ;;  %v3868_v52 = vpop.f32.mrb[6].mxu0 }
 0x109   : > { %v3869_v42 = vpop.f32.mrb[7].mxu0 }
 0x10a   : > { %v3870_v36 = vadd.f32 %v3869_v42, %v3868_v52 }
 0x10e   : > { %v3871_v37 = vpop.f32.mrb[8].mxu0 }
 0x10f   : > { %v3872_v0 = vpop.f32.mrb[9].mxu0 }
 0x110   : > { %v3873_v40 = vadd.f32 %v3872_v0, %v3871_v37  ;;  %v3874_v38 = vpop.f32.mrb[10].mxu0 }
 0x111   : > { %v3875_v39 = vpop.f32.mrb[11].mxu0 }
 0x112   : > { %v3876_v41 = vadd.f32 %v3875_v39, %v3874_v38 }
 0x116   : > { %v3877_v43 = vpop.f32.mrb[12].mxu0 }
 0x117   : > { %v3878_v44 = vpop.f32.mrb[13].mxu0 }
 0x118   : > { %v3879_v46 = vadd.f32 %v3878_v44, %v3877_v43  ;;  %v3880_v47 = vpop.f32.mrb[14].mxu0 }
 0x119   : > { %v3881_v45 = vpop.f32.mrb[15].mxu0 }
 0x11a   : > { %v3882_v48 = vadd.f32 %v3881_v45, %v3880_v47 }
 0x11e   : > { %v3883_v49 = vpop.f32.mrb[16].mxu0  ;;  %v3939_v55 = vpop.f32.mrb[16].mxu1 }
 0x11f   : > { %v3884_v50 = vpop.f32.mrb[17].mxu0  ;;  %v3940_v57 = vpop.f32.mrb[17].mxu1 }
 0x120   : > { %v3885_v51 = vadd.f32 %v3884_v50, %v3883_v49  ;;  %v3886_v53 = vpop.f32.mrb[18].mxu0  ;;  %v3941_v25 = vadd.f32 %v3940_v57, %v3939_v55  ;;  %v3942_v58 = vpop.f32.mrb[18].mxu1 }
 0x121   : > { %v3887_v54 = vpop.f32.mrb[19].mxu0  ;;  %v3943_v59 = vpop.f32.mrb[19].mxu1 }
 0x122   : > { %v3888_v56 = vadd.f32 %v3887_v54, %v3886_v53  ;;  %v3944_v60 = vadd.f32 %v3943_v59, %v3942_v58  ;;  %v5157_v61 = vadd.f32 %v3941_v25, %v3861_v28 }
 0x124   : > { %v5159_v63 = vadd.f32 %v3944_v60, %v3864_v31 }
 0x126   : > { %v3889_v62 = vpop.f32.mrb[20].mxu0 }
 0x127   : > { %v3890_v1 = vpop.f32.mrb[21].mxu0  ;;  %v3945_v4 = vpop.f32.mrb[20].mxu1 }
 0x128   : > { %v3891_v15 = vadd.f32 %v3890_v1, %v3889_v62  ;;  %v3892_v2 = vpop.f32.mrb[22].mxu0  ;;  %v3946_v19 = vpop.f32.mrb[21].mxu1 }
 0x129   : > { %v3893_v3 = vpop.f32.mrb[23].mxu0  ;;  %v3947_v6 = vadd.f32 %v3946_v19, %v3945_v4  ;;  %v3948_v7 = vpop.f32.mrb[22].mxu1 }
 0x12a   : > { %v3894_v5 = vadd.f32 %v3893_v3, %v3892_v2  ;;  %v3949_v8 = vpop.f32.mrb[23].mxu1 }
 0x12b   : > { %v3950_v9 = vadd.f32 %v3949_v8, %v3948_v7  ;;  %v5161_v10 = vadd.f32 %v3947_v6, %v3867_v35 }
 0x12d   : > { %v5163_v13 = vadd.f32 %v3950_v9, %v3870_v36 }
 0x12e   : > { %v3895_v11 = vpop.f32.mrb[24].mxu0 }
 0x12f   : > { %v3896_v14 = vpop.f32.mrb[25].mxu0  ;;  %v3951_v20 = vpop.f32.mrb[24].mxu1 }
 0x130   : > { %v3897_v16 = vadd.f32 %v3896_v14, %v3895_v11  ;;  %v3898_v17 = vpop.f32.mrb[26].mxu0  ;;  %v3952_v12 = vpop.f32.mrb[25].mxu1 }
 0x131   : > { %v3899_v18 = vpop.f32.mrb[27].mxu0  ;;  %v3953_v33 = vadd.f32 %v3952_v12, %v3951_v20  ;;  %v3954_v22 = vpop.f32.mrb[26].mxu1 }
 0x132   : > { %v3900_v21 = vadd.f32 %v3899_v18, %v3898_v17  ;;  %v3955_v23 = vpop.f32.mrb[27].mxu1 }
 0x133   : > { %v3956_v24 = vadd.f32 %v3955_v23, %v3954_v22  ;;  %v5165_v26 = vadd.f32 %v3953_v33, %v3873_v40 }
 0x135   : > { %v5167_v28 = vadd.f32 %v3956_v24, %v3876_v41 }
 0x136   : > { %v3901_v27 = vpop.f32.mrb[28].mxu0 }
 0x137   : > { %v3902_v29 = vpop.f32.mrb[29].mxu0  ;;  %v3957_v34 = vpop.f32.mrb[28].mxu1 }
 0x138   : > { %v3903_v30 = vadd.f32 %v3902_v29, %v3901_v27  ;;  %v3904_v31 = vpop.f32.mrb[30].mxu0  ;;  %v3958_v52 = vpop.f32.mrb[29].mxu1 }
 0x139   : > { %v3905_v32 = vpop.f32.mrb[31].mxu0  ;;  %v3959_v42 = vadd.f32 %v3958_v52, %v3957_v34  ;;  %v3960_v36 = vpop.f32.mrb[30].mxu1 }
 0x13a   : > { %v3906_v35 = vadd.f32 %v3905_v32, %v3904_v31  ;;  %v3961_v37 = vpop.f32.mrb[31].mxu1 }
 0x13b   : > { %v3962_v0 = vadd.f32 %v3961_v37, %v3960_v36  ;;  %v5169_v38 = vadd.f32 %v3959_v42, %v3879_v46 }
 0x13d   : > { %v5171_v39 = vadd.f32 %v3962_v0, %v3882_v48 }
 0x13e   : > { %v4019_v44 = vpop.f32.mrb[32].mxu0 }
 0x13f   : > { %v3963_v40 = vpop.f32.mrb[32].mxu1  ;;  %v4020_v45 = vpop.f32.mrb[33].mxu0 }
 0x140   : > { %v3964_v43 = vpop.f32.mrb[33].mxu1  ;;  %v4021_v53 = vadd.f32 %v4020_v45, %v4019_v44  ;;  %v4022_v54 = vpop.f32.mrb[34].mxu0 }
 0x141   : > { %v3965_v41 = vadd.f32 %v3964_v43, %v3963_v40  ;;  %v3966_v47 = vpop.f32.mrb[34].mxu1  ;;  %v4023_v57 = vpop.f32.mrb[35].mxu0 }
 0x142   : > { %v3967_v49 = vpop.f32.mrb[35].mxu1  ;;  %v4024_v58 = vadd.f32 %v4023_v57, %v4022_v54 }
 0x143   : > { %v5173_v50 = vadd.f32 %v3965_v41, %v3885_v51  ;;  %v3968_v55 = vadd.f32 %v3967_v49, %v3966_v47 }
 0x145   : > { %v5175_v25 = vadd.f32 %v3968_v55, %v3888_v56 }
 0x146   : > { %v4025_v1 = vpop.f32.mrb[36].mxu0 }
 0x147   : > { %v3969_v46 = vpop.f32.mrb[36].mxu1  ;;  %v4026_v4 = vpop.f32.mrb[37].mxu0 }
 0x148   : > { %v3970_v59 = vpop.f32.mrb[37].mxu1  ;;  %v4027_v19 = vadd.f32 %v4026_v4, %v4025_v1  ;;  %v4028_v51 = vpop.f32.mrb[38].mxu0 }
 0x149   : > { %v3971_v48 = vadd.f32 %v3970_v59, %v3969_v46  ;;  %v3972_v60 = vpop.f32.mrb[38].mxu1  ;;  %v4029_v7 = vpop.f32.mrb[39].mxu0 }
 0x14a   : > { %v3973_v62 = vpop.f32.mrb[39].mxu1  ;;  %v4030_v8 = vadd.f32 %v4029_v7, %v4028_v51 }
 0x14b   : > { %v5177_v2 = vadd.f32 %v3971_v48, %v3891_v15  ;;  %v3974_v3 = vadd.f32 %v3973_v62, %v3972_v60 }
 0x14d   : > { %v5179_v6 = vadd.f32 %v3974_v3, %v3894_v5 }
 0x14f   : > { %v3975_v9 = vpop.f32.mrb[40].mxu1 }
 0x150   : > { %v3976_v56 = vpop.f32.mrb[41].mxu1  ;;  %v4031_v12 = vpop.f32.mrb[40].mxu0 }
 0x151   : > { %v3977_v11 = vadd.f32 %v3976_v56, %v3975_v9  ;;  %v3978_v14 = vpop.f32.mrb[42].mxu1  ;;  %v4032_v33 = vpop.f32.mrb[41].mxu0 }
 0x152   : > { %v3979_v17 = vpop.f32.mrb[43].mxu1  ;;  %v4033_v22 = vadd.f32 %v4032_v33, %v4031_v12  ;;  %v4034_v23 = vpop.f32.mrb[42].mxu0 }
 0x153   : > { %v5181_v18 = vadd.f32 %v3977_v11, %v3897_v16  ;;  %v3980_v20 = vadd.f32 %v3979_v17, %v3978_v14  ;;  %v4035_v24 = vpop.f32.mrb[43].mxu0 }
 0x154   : > { %v4036_v27 = vadd.f32 %v4035_v24, %v4034_v23 }
 0x155   : > { %v5183_v15 = vadd.f32 %v3980_v20, %v3900_v21 }
 0x157   : > { %v3981_v5 = vpop.f32.mrb[44].mxu1 }
 0x158   : > { %v3982_v29 = vpop.f32.mrb[45].mxu1  ;;  %v4037_v52 = vpop.f32.mrb[44].mxu0 }
 0x159   : > { %v3983_v31 = vadd.f32 %v3982_v29, %v3981_v5  ;;  %v3984_v32 = vpop.f32.mrb[46].mxu1  ;;  %v4038_v16 = vpop.f32.mrb[45].mxu0 }
 0x15a   : > { %v3985_v34 = vpop.f32.mrb[47].mxu1  ;;  %v4039_v37 = vadd.f32 %v4038_v16, %v4037_v52  ;;  %v4040_v0 = vpop.f32.mrb[46].mxu0 }
 0x15b   : > { %v5185_v42 = vadd.f32 %v3983_v31, %v3903_v30  ;;  %v3986_v36 = vadd.f32 %v3985_v34, %v3984_v32  ;;  %v4041_v21 = vpop.f32.mrb[47].mxu0 }
 0x15c   : > { %v4042_v43 = vadd.f32 %v4041_v21, %v4040_v0 }
 0x15d   : > { %v5187_v40 = vadd.f32 %v3986_v36, %v3906_v35 }
 0x15f   : > { %v4133_v44 = vpop.f32.mrb[0].mxu1 }
 0x160   : > { %v4196_v41 = vadd.f32 %v5161_v10, %v4133_v44  ;;  %v2000_v47 = vpop.f32.mrb[1].mxu1  ;;  %v4043_v45 = vpop.f32.mrb[48].mxu0 }
 0x161   : > { %v4200_v49 = vadd.f32 %v5157_v61, %v2000_v47  ;;  %v4134_v54 = vpop.f32.mrb[2].mxu1  ;;  %v4044_v55 = vpop.f32.mrb[49].mxu0 }
 0x162   : > { %v4204_v30 = vadd.f32 %v5163_v13, %v4134_v54  ;;  %v2003_v57 = vpop.f32.mrb[3].mxu1  ;;  %v4197_v46 = vadd.f32 %v4196_v41, %v4027_v19  ;;  %v4045_v59 = vadd.f32 %v4044_v55, %v4043_v45  ;;  %v4046_v48 = vpop.f32.mrb[50].mxu0 }
 0x163   : > { %v4208_v35 = vadd.f32 %v5159_v63, %v2003_v57  ;;  %v4201_v60 = vadd.f32 %v4200_v49, %v4021_v53  ;;  %v4047_v62 = vpop.f32.mrb[51].mxu0 }
 0x164   : > { %v5193_v1 = vadd.f32 %v4204_v30, %v4030_v8  ;;  %v4048_v3 = vadd.f32 %v4047_v62, %v4046_v48  ;;  %v4231_v10 = vadd.f32 %v5173_v50, %v4045_v59 }
 0x165   : > { %v5196_v4 = vadd.f32 %v4208_v35, %v4024_v58 }
 0x166   : > { %v4237_v51 = vadd.f32 %v5175_v25, %v4048_v3 }
 0x167   : > { %v4137_v61 = vpop.f32.mrb[4].mxu1 }
 0x168   : > { %v4212_v13 = vadd.f32 %v5169_v38, %v4137_v61  ;;  %v2016_v7 = vpop.f32.mrb[5].mxu1  ;;  %v4049_v56 = vpop.f32.mrb[52].mxu0 }
 0x169   : > { %v4216_v19 = vadd.f32 %v5165_v26, %v2016_v7  ;;  %v4138_v9 = vpop.f32.mrb[6].mxu1  ;;  %v4050_v11 = vpop.f32.mrb[53].mxu0 }
 0x16a   : > { %v4220_v63 = vadd.f32 %v5171_v39, %v4138_v9  ;;  %v2019_v53 = vpop.f32.mrb[7].mxu1  ;;  %v5202_v8 = vadd.f32 %v4212_v13, %v4039_v37  ;;  %v4051_v38 = vadd.f32 %v4050_v11, %v4049_v56  ;;  %v4052_v14 = vpop.f32.mrb[54].mxu0 }
 0x16b   : > { %v4224_v50 = vadd.f32 %v5167_v28, %v2019_v53  ;;  %v5205_v58 = vadd.f32 %v4216_v19, %v4033_v22  ;;  %v4053_v17 = vpop.f32.mrb[55].mxu0 }
 0x16c   : > { %v5207_v25 = vadd.f32 %v4220_v63, %v4042_v43  ;;  %v4054_v20 = vadd.f32 %v4053_v17, %v4052_v14  ;;  %v4228_v39 = vadd.f32 %v5177_v2, %v4051_v38 }
 0x16d   : > { %v5209_v26 = vadd.f32 %v4224_v50, %v4036_v27 }
 0x16e   : > { %v4234_v12 = vadd.f32 %v5179_v6, %v4054_v20 }
 0x170   : > { %v4055_v33 = vpop.f32.mrb[56].mxu0 }
 0x171   : > { %v4056_v28 = vpop.f32.mrb[57].mxu0 }
 0x172   : > { %v4057_v22 = vadd.f32 %v4056_v28, %v4055_v33  ;;  %v4058_v23 = vpop.f32.mrb[58].mxu0 }
 0x173   : > { %v4059_v24 = vpop.f32.mrb[59].mxu0 }
 0x174   : > { %v4060_v5 = vadd.f32 %v4059_v24, %v4058_v23  ;;  %v4243_v29 = vadd.f32 %v5181_v18, %v4057_v22 }
 0x176   : > { %v5218_v27 = vadd.f32 %v5183_v15, %v4060_v5 }
 0x178   : > { %v4061_v31 = vpop.f32.mrb[60].mxu0 }
 0x179   : > { %v4062_v2 = vpop.f32.mrb[61].mxu0 }
 0x17a   : > { %v4063_v6 = vadd.f32 %v4062_v2, %v4061_v31  ;;  %v4064_v32 = vpop.f32.mrb[62].mxu0 }
 0x17b   : > { %v4065_v34 = vpop.f32.mrb[63].mxu0 }
 0x17c   : > { %v4066_v52 = vadd.f32 %v4065_v34, %v4064_v32  ;;  %v4240_v36 = vadd.f32 %v5185_v42, %v4063_v6 }
 0x17e   : > { %v4246_v37 = vadd.f32 %v5187_v40, %v4066_v52 }
 0x17f   : > { %v4173_v16 = vpop.f32.mrb[8].mxu1 }
 0x180   : > { %v5222_v0 = vadd.f32 %v4228_v39, %v4173_v16  ;;  %v2964_v18 = vpop.f32.mrb[9].mxu1  ;;  %v4165_v15 = vpop.f32.mrb[64].mxu0 }
 0x181   : > { %v5224_v21 = vadd.f32 %v4231_v10, %v2964_v18  ;;  %v4174_v43 = vpop.f32.mrb[10].mxu1  ;;  %v4198_v44 = vadd.f32 %v4197_v46, %v4165_v15  ;;  %v2932_v41 = vpop.f32.mrb[65].mxu0 }
 0x182   : > { %v5226_v47 = vadd.f32 %v4234_v12, %v4174_v43  ;;  %v2967_v45 = vpop.f32.mrb[11].mxu1  ;;  %v4202_v49 = vadd.f32 %v4201_v60, %v2932_v41  ;;  %v4166_v42 = vpop.f32.mrb[66].mxu0  ;;  %v3171_v43 = vmul.f32 %v5222_v0, %v5222_v0 }
 0x183   : > { %v4238_v40 = vadd.f32 %v4237_v51, %v2967_v45  ;;  %v4206_v54 = vadd.f32 %v5193_v1, %v4166_v42  ;;  %v2935_v30 = vpop.f32.mrb[67].mxu0  ;;  %v3163_v61 = vmul.f32 %v4198_v44, %v4198_v44 }
 0x184   : > { %v3824_v55 = vpack.c.bf16 %v5226_v47, %v5222_v0  ;;  %v4210_v57 = vadd.f32 %v5196_v4, %v2935_v30  ;;  %v3161_v48 = vmul.f32 %v4202_v49, %v4202_v49  ;;  %v3172_v45 = vmul.f32 %v5226_v47, %v5226_v47 }
 0x185   : > { %v3819_v46 = vpack.c.bf16 %v4238_v40, %v5224_v21  ;;  %v3804_v59 = vpack.c.bf16 %v4206_v54, %v4198_v44  ;;  %v3164_v50 = vmul.f32 %v4206_v54, %v4206_v54 }
 0x186   : > { %3840 = vst [vmem:[%s5231_s12 + $0x28] sm:$0xff] %v3824_v55   ;;  %v3799_v35 = vpack.c.bf16 %v4210_v57, %v4202_v49  ;;  %v3139_v60 = vadd.f32 %v4210_v57, %v4202_v49  ;;  %v3162_v62 = vmul.f32 %v4210_v57, %v4210_v57 }
 0x187   : > { %3839 = vst [vmem:[%s5231_s12 + $0x20] sm:$0xff] %v3819_v46   ;;  %v4177_v3 = vpop.f32.mrb[12].mxu1  ;;  %3836 = vst [vmem:[%s5231_s12 + $0x8] sm:$0xff] %v3804_v59  }
 0x188   : > { %v4241_v10 = vadd.f32 %v4240_v36, %v4177_v3  ;;  %v2980_v1 = vpop.f32.mrb[13].mxu1  ;;  %3800 = vst [vmem:[%s5231_s12] sm:$0xff] %v3799_v35   ;;  %v3140_v51 = vadd.f32 %v4198_v44, %v3139_v60  ;;  %v3177_v13 = vadd.f32 %v3162_v62, %v3161_v48  ;;  %v4169_v7 = vpop.f32.mrb[68].mxu0 }
 0x189   : > { %v4244_v19 = vadd.f32 %v4243_v29, %v2980_v1  ;;  %v4178_v4 = vpop.f32.mrb[14].mxu1  ;;  %v4214_v9 = vadd.f32 %v5202_v8, %v4169_v7  ;;  %v2948_v63 = vpop.f32.mrb[69].mxu0 }
 0x18a   : > { %v4247_v53 = vadd.f32 %v4246_v37, %v4178_v4  ;;  %v2983_v56 = vpop.f32.mrb[15].mxu1  ;;  %v3178_v11 = vadd.f32 %v3177_v13, %v3163_v61  ;;  %v4218_v38 = vadd.f32 %v5205_v58, %v2948_v63  ;;  %v3141_v14 = vadd.f32 %v4206_v54, %v3140_v51  ;;  %v4170_v17 = vpop.f32.mrb[70].mxu0 }
 0x18b   : > { %v4222_v20 = vadd.f32 %v5207_v25, %v4170_v17  ;;  %v2951_v12 = vpop.f32.mrb[71].mxu0  ;;  %v4250_v24 = vadd.f32 %v5218_v27, %v2983_v56  ;;  %v3167_v25 = vmul.f32 %v4214_v9, %v4214_v9  ;;  %v3170_v37 = vmul.f32 %v4238_v40, %v4238_v40 }
 0x18c   : > { %v3834_v39 = vpack.c.bf16 %v4247_v53, %v4241_v10  ;;  %v3142_v33 = vadd.f32 %v4218_v38, %v3141_v14  ;;  %v3165_v28 = vmul.f32 %v4218_v38, %v4218_v38  ;;  %v3179_v8 = vadd.f32 %v3178_v11, %v3164_v50 }
 0x18d   : > { %v4226_v22 = vadd.f32 %v5209_v26, %v2951_v12  ;;  %v3814_v23 = vpack.c.bf16 %v4222_v20, %v4214_v9  ;;  %v3829_v2 = vpack.c.bf16 %v4250_v24, %v4244_v19  ;;  %v3168_v34 = vmul.f32 %v4222_v20, %v4222_v20 }
 0x18e   : > { %3842 = vst [vmem:[%s5231_s12 + $0x38] sm:$0xff] %v3834_v39   ;;  %v3180_v5 = vadd.f32 %v3179_v8, %v3165_v28  ;;  %v3169_v26 = vmul.f32 %v5224_v21, %v5224_v21  ;;  %v3173_v54 = vmul.f32 %v4244_v19, %v4244_v19  ;;  %v3174_v57 = vmul.f32 %v4250_v24, %v4250_v24 }
 0x18f   : > { %v3809_v58 = vpack.c.bf16 %v4226_v22, %v4218_v38  ;;  %v3143_v29 = vadd.f32 %v4226_v22, %v3142_v33  ;;  %v3166_v31 = vmul.f32 %v4226_v22, %v4226_v22  ;;  %3838 = vst [vmem:[%s5231_s12 + $0x18] sm:$0xff] %v3814_v23   ;;  %3841 = vst [vmem:[%s5231_s12 + $0x30] sm:$0xff] %v3829_v2  }
 0x190   : > { %v3175_v59 = vmul.f32 %v4241_v10, %v4241_v10  ;;  %v3176_v35 = vmul.f32 %v4247_v53, %v4247_v53 }
 0x191   : > { %3837 = vst [vmem:[%s5231_s12 + $0x10] sm:$0xff] %v3809_v58   ;;  %v3144_v6 = vadd.f32 %v4214_v9, %v3143_v29  ;;  %v3181_v32 = vadd.f32 %v3180_v5, %v3166_v31 }
 0x193   : > { %v3145_v52 = vadd.f32 %v4222_v20, %v3144_v6  ;;  %v3182_v36 = vadd.f32 %v3181_v32, %v3167_v25 }
 0x195   : > { %v3146_v16 = vadd.f32 %v5224_v21, %v3145_v52  ;;  %v3183_v27 = vadd.f32 %v3182_v36, %v3168_v34 }
 0x197   : > { %v3184_v18 = vadd.f32 %v3183_v27, %v3169_v26  ;;  %v3147_v15 = vadd.f32 %v4238_v40, %v3146_v16 }
 0x199   : > { %v3148_v44 = vadd.f32 %v5222_v0, %v3147_v15  ;;  %v3185_v41 = vadd.f32 %v3184_v18, %v3170_v37 }
 0x19b   : > { %v3149_v49 = vadd.f32 %v5226_v47, %v3148_v44  ;;  %v3186_v42 = vadd.f32 %v3185_v41, %v3171_v43 }
 0x19d   : > { %v3150_v55 = vadd.f32 %v4244_v19, %v3149_v49  ;;  %v3187_v30 = vadd.f32 %v3186_v42, %v3172_v45 }
 0x19f   : > { %v3151_v21 = vadd.f32 %v4250_v24, %v3150_v55  ;;  %v3188_v46 = vadd.f32 %v3187_v30, %v3173_v54 }
 0x1a1   : > { %v3152_v40 = vadd.f32 %v4241_v10, %v3151_v21  ;;  %v3189_v48 = vadd.f32 %v3188_v46, %v3174_v57 }
 0x1a3   : > { %v3153_v0 = vadd.f32 %v4247_v53, %v3152_v40  ;;  %v3190_v60 = vadd.f32 %v3189_v48, %v3175_v59 }
 0x1a5   : > { %v3154_v62 = vrot.slane %v3153_v0, 4  ;;  %v3191_v3 = vadd.f32 %v3190_v60, %v3176_v35 }
 0x1a7   : > { %v3155_v1 = vadd.f32 %v3154_v62, %v3153_v0  ;;  %v3192_v61 = vrot.slane %v3191_v3, 4 }
 0x1a9   : > { %v3156_v47 = vrot.slane %v3155_v1, 2  ;;  %v3193_v51 = vadd.f32 %v3192_v61, %v3191_v3 }
 0x1ab   : > { %v3157_v13 = vadd.f32 %v3156_v47, %v3155_v1  ;;  %v3194_v7 = vrot.slane %v3193_v51, 2 }
 0x1ad   : > { %v3158_v19 = vrot.slane %v3157_v13, 1  ;;  %v3195_v4 = vadd.f32 %v3194_v7, %v3193_v51 }
 0x1af   : > { %v3159_v10 = vadd.f32 %v3158_v19, %v3157_v13  ;;  %v3196_v9 = vrot.slane %v3195_v4, 1 }
 0x1b1   : > { %3160 = vst [vmem:[%s264_s22] sm:$0x1] %v3159_v10  ;;  %v3197_v63 = vadd.f32 %v3196_v9, %v3195_v4 }
 0x1b3   : > { %3198 = vst [vmem:[%s271_s25] sm:$0x1] %v3197_v63 }
 0x1b4 PF: > { %s15_s19 = sadd.s32 1, %s4450_s19   ;;  %s5292_s15 = smov %s4442_s17 }
 0x1b5   : > { %p12_p8 = scmp.ge.s32.totalorder %s15_s19, 6   ;;  %s5293_s16 = smov %s4446_s18 }
 0x1b6   : > { %s5294_s17 = smov %s5297_s20  ;;  %s5295_s18 = smov %s5301_s21 }
 0x1b7   :  { %14 = sbr.rel (!%p12_p8) target bundleno = 3 (0x3), region = 86 }

</bundles_post_ra>
